<compile_context>
chip_gen: v7x
topology: tpu7x:2x2x1
jax: 0.10.0
libtpu: 0.0.40
codegen_flags: <defaults>
</compile_context>

<pallas_src>
import jax
import jax.numpy as jnp
from jax.experimental import pallas as pl
from jax.experimental.pallas import tpu as pltpu

OUT_FEATURES = 6
OUT_PAD = 128  # lane-dense padded output width


def _round_up(n, m):
    return ((n + m - 1) // m) * m


def _mlp_kernel(x_ref,
                w1_ref, b1_ref,
                w2_ref, b2_ref,
                w3_ref, b3_ref,
                w4_ref, b4_ref,
                out_ref):
    # One (TB, 9) batch tile per grid step; weights are resident in VMEM.
    x = x_ref[...]

    h = jnp.dot(x, w1_ref[...], preferred_element_type=jnp.float32) + b1_ref[...]
    h = jnp.maximum(h, 0.0)

    h = jnp.dot(h, w2_ref[...], preferred_element_type=jnp.float32) + b2_ref[...]
    h = jnp.maximum(h, 0.0)

    h = jnp.dot(h, w3_ref[...], preferred_element_type=jnp.float32) + b3_ref[...]
    h = jnp.maximum(h, 0.0)

    # Last layer is padded to 128 lanes; padded lanes have bias -1e30 so their
    # exp() underflows to exactly 0 and the softmax over 128 lanes equals the
    # softmax over the real 6 logits.
    logits = jnp.dot(h, w4_ref[...], preferred_element_type=jnp.float32) + b4_ref[...]

    m = jnp.max(logits, axis=1, keepdims=True)
    e = jnp.exp(logits - m)
    denom = jnp.sum(e, axis=1, keepdims=True)
    out_ref[...] = e * pl.reciprocal(denom, approx=True)


def net_forward(x, params, *, tb=256):
    """x: [B, 9] float32. params: dict of (w, b) with w as [in, out], b as [1, out].

    Returns [B, 6] softmax probabilities (PyTorch dim=1 semantics).
    """
    B = x.shape[0]
    w1, b1 = params["l1"]
    w2, b2 = params["l2"]
    w3, b3 = params["l3"]
    w4, b4 = params["l4"]

    # Lane-dense padding of the final layer (zeros for weights, -1e30 for bias).
    w4p = jnp.pad(w4, ((0, 0), (0, OUT_PAD - OUT_FEATURES)))
    b4p = jnp.pad(b4, ((0, 0), (0, OUT_PAD - OUT_FEATURES)), constant_values=-1e30)

    # Batch tiling: TB multiple of 8, at most `tb`; pad the batch up to a
    # multiple of TB (padded rows are discarded after the call).
    TB = min(tb, _round_up(B, 8))
    Bp = _round_up(B, TB)
    if Bp != B:
        x = jnp.pad(x, ((0, Bp - B), (0, 0)))

    weight_spec = lambda a: pl.BlockSpec(a.shape, lambda i: (0, 0))

    out_padded = pl.pallas_call(
        _mlp_kernel,
        out_shape=jax.ShapeDtypeStruct((Bp, OUT_PAD), jnp.float32),
        grid=(Bp // TB,),
        in_specs=[
            pl.BlockSpec((TB, 9), lambda i: (i, 0)),       # x: tiled over batch
            weight_spec(w1), weight_spec(b1),              # weights: resident
            weight_spec(w2), weight_spec(b2),
            weight_spec(w3), weight_spec(b3),
            weight_spec(w4p), weight_spec(b4p),
        ],
        out_specs=pl.BlockSpec((TB, OUT_PAD), lambda i: (i, 0)),
        compiler_params=pltpu.CompilerParams(
            dimension_semantics=("parallel",)),
    )(x, w1, b1, w2, b2, w3, b3, w4p, b4p)

    return out_padded[:B, :OUT_FEATURES]


def init_params(key):
    """Deterministic init mimicking PyTorch nn.Linear default (U[-1/sqrt(fan_in), +])."""
    dims = [(9, 128), (128, 64), (64, 32), (32, OUT_FEATURES)]
    names = ["l1", "l2", "l3", "l4"]
    params = {}
    for name, (fan_in, fan_out) in zip(names, dims):
        key, kw, kb = jax.random.split(key, 3)
        bound = 1.0 / jnp.sqrt(jnp.float32(fan_in))
        w = jax.random.uniform(kw, (fan_in, fan_out), jnp.float32, -bound, bound)
        b = jax.random.uniform(kb, (1, fan_out), jnp.float32, -bound, bound)
        params[name] = (w, b)
    return params


def reference_forward(x, params):
    h = x
    for name in ["l1", "l2", "l3"]:
        w, b = params[name]
        h = jnp.maximum(h @ w + b, 0.0)
    w, b = params["l4"]
    return jax.nn.softmax(h @ w + b, axis=1)


if __name__ == "__main__":
    key = jax.random.PRNGKey(0)
    kx, kp = jax.random.split(key)

    # Small but multi-tile batch (exercises grid pipelining + last-tile padding).
    B = 300
    x = jax.random.normal(kx, (B, 9), dtype=jnp.float32)
    params = init_params(kp)

    out = net_forward(x, params)
    out = jax.block_until_ready(out)

    ref = reference_forward(x, params)
    assert out.shape == (B, OUT_FEATURES)
    # approx=True reciprocal -> relax tolerances slightly vs exact softmax.
    assert jnp.allclose(jnp.sum(out, axis=1), 1.0, atol=2e-3)
    assert jnp.allclose(out, ref, atol=2e-3, rtol=2e-3)

    print("KERNEL_OK")
</pallas_src>

<mosaic_0001>
module attributes {stable_mosaic.version = 11 : i64} {
  func.func @_mlp_kernel(%arg0: i32, %arg1: memref<256x9xf32, #tpu.memory_space<vmem>>, %arg2: memref<9x128xf32, #tpu.memory_space<vmem>>, %arg3: memref<1x128xf32, #tpu.memory_space<vmem>>, %arg4: memref<128x64xf32, #tpu.memory_space<vmem>>, %arg5: memref<1x64xf32, #tpu.memory_space<vmem>>, %arg6: memref<64x32xf32, #tpu.memory_space<vmem>>, %arg7: memref<1x32xf32, #tpu.memory_space<vmem>>, %arg8: memref<32x128xf32, #tpu.memory_space<vmem>>, %arg9: memref<1x128xf32, #tpu.memory_space<vmem>>, %arg10: memref<256x128xf32, #tpu.memory_space<vmem>>) attributes {dimension_semantics = [#tpu.dimension_semantics<parallel>], iteration_bounds = array<i64: 2>, scalar_prefetch = 0 : i64, scratch_operands = 0 : i64, tpu.core_type = #tpu.core_type<tc>, window_params = [{transform_indices = @transform_0, window_bounds = array<i64: 256, 9>}, {pipeline_mode = #tpu.pipeline_mode<synchronous>, transform_indices = @transform_1, window_bounds = array<i64: 9, 128>}, {pipeline_mode = #tpu.pipeline_mode<synchronous>, transform_indices = @transform_2, window_bounds = array<i64: 1, 128>}, {pipeline_mode = #tpu.pipeline_mode<synchronous>, transform_indices = @transform_3, window_bounds = array<i64: 128, 64>}, {pipeline_mode = #tpu.pipeline_mode<synchronous>, transform_indices = @transform_4, window_bounds = array<i64: 1, 64>}, {pipeline_mode = #tpu.pipeline_mode<synchronous>, transform_indices = @transform_5, window_bounds = array<i64: 64, 32>}, {pipeline_mode = #tpu.pipeline_mode<synchronous>, transform_indices = @transform_6, window_bounds = array<i64: 1, 32>}, {pipeline_mode = #tpu.pipeline_mode<synchronous>, transform_indices = @transform_7, window_bounds = array<i64: 32, 128>}, {pipeline_mode = #tpu.pipeline_mode<synchronous>, transform_indices = @transform_8, window_bounds = array<i64: 1, 128>}, {transform_indices = @transform_9, window_bounds = array<i64: 256, 128>}]} {
    %c0 = arith.constant 0 : index
    %c0_0 = arith.constant 0 : index
    %0 = vector.load %arg1[%c0, %c0_0] : memref<256x9xf32, #tpu.memory_space<vmem>>, vector<256x9xf32>
    %c0_1 = arith.constant 0 : index
    %c0_2 = arith.constant 0 : index
    %1 = vector.load %arg2[%c0_1, %c0_2] : memref<9x128xf32, #tpu.memory_space<vmem>>, vector<9x128xf32>
    %cst = arith.constant dense<0.000000e+00> : vector<256x128xf32>
    %2 = tpu.matmul %0, %1, %cst {dimension_numbers = #tpu.dot_dimension_numbers<[1], [0], [0], [1], [0, 0, 1, 1], [], []>} : vector<256x9xf32>, vector<9x128xf32>, vector<256x128xf32> -> vector<256x128xf32>
    %c0_3 = arith.constant 0 : index
    %c0_4 = arith.constant 0 : index
    %3 = vector.load %arg3[%c0_3, %c0_4] : memref<1x128xf32, #tpu.memory_space<vmem>>, vector<1x128xf32>
    %4 = vector.broadcast %3 : vector<1x128xf32> to vector<256x128xf32>
    %5 = arith.addf %2, %4 : vector<256x128xf32>
    %cst_5 = arith.constant 0.000000e+00 : f32
    %6 = vector.broadcast %cst_5 : f32 to vector<256x128xf32>
    %7 = arith.maximumf %5, %6 : vector<256x128xf32>
    %c0_6 = arith.constant 0 : index
    %c0_7 = arith.constant 0 : index
    %8 = vector.load %arg4[%c0_6, %c0_7] : memref<128x64xf32, #tpu.memory_space<vmem>>, vector<128x64xf32>
    %cst_8 = arith.constant dense<0.000000e+00> : vector<256x64xf32>
    %9 = tpu.matmul %7, %8, %cst_8 {dimension_numbers = #tpu.dot_dimension_numbers<[1], [0], [0], [1], [0, 0, 1, 1], [], []>} : vector<256x128xf32>, vector<128x64xf32>, vector<256x64xf32> -> vector<256x64xf32>
    %c0_9 = arith.constant 0 : index
    %c0_10 = arith.constant 0 : index
    %10 = vector.load %arg5[%c0_9, %c0_10] : memref<1x64xf32, #tpu.memory_space<vmem>>, vector<1x64xf32>
    %11 = vector.broadcast %10 : vector<1x64xf32> to vector<256x64xf32>
    %12 = arith.addf %9, %11 : vector<256x64xf32>
    %cst_11 = arith.constant 0.000000e+00 : f32
    %13 = vector.broadcast %cst_11 : f32 to vector<256x64xf32>
    %14 = arith.maximumf %12, %13 : vector<256x64xf32>
    %c0_12 = arith.constant 0 : index
    %c0_13 = arith.constant 0 : index
    %15 = vector.load %arg6[%c0_12, %c0_13] : memref<64x32xf32, #tpu.memory_space<vmem>>, vector<64x32xf32>
    %cst_14 = arith.constant dense<0.000000e+00> : vector<256x32xf32>
    %16 = tpu.matmul %14, %15, %cst_14 {dimension_numbers = #tpu.dot_dimension_numbers<[1], [0], [0], [1], [0, 0, 1, 1], [], []>} : vector<256x64xf32>, vector<64x32xf32>, vector<256x32xf32> -> vector<256x32xf32>
    %c0_15 = arith.constant 0 : index
    %c0_16 = arith.constant 0 : index
    %17 = vector.load %arg7[%c0_15, %c0_16] : memref<1x32xf32, #tpu.memory_space<vmem>>, vector<1x32xf32>
    %18 = vector.broadcast %17 : vector<1x32xf32> to vector<256x32xf32>
    %19 = arith.addf %16, %18 : vector<256x32xf32>
    %cst_17 = arith.constant 0.000000e+00 : f32
    %20 = vector.broadcast %cst_17 : f32 to vector<256x32xf32>
    %21 = arith.maximumf %19, %20 : vector<256x32xf32>
    %c0_18 = arith.constant 0 : index
    %c0_19 = arith.constant 0 : index
    %22 = vector.load %arg8[%c0_18, %c0_19] : memref<32x128xf32, #tpu.memory_space<vmem>>, vector<32x128xf32>
    %cst_20 = arith.constant dense<0.000000e+00> : vector<256x128xf32>
    %23 = tpu.matmul %21, %22, %cst_20 {dimension_numbers = #tpu.dot_dimension_numbers<[1], [0], [0], [1], [0, 0, 1, 1], [], []>} : vector<256x32xf32>, vector<32x128xf32>, vector<256x128xf32> -> vector<256x128xf32>
    %c0_21 = arith.constant 0 : index
    %c0_22 = arith.constant 0 : index
    %24 = vector.load %arg9[%c0_21, %c0_22] : memref<1x128xf32, #tpu.memory_space<vmem>>, vector<1x128xf32>
    %25 = vector.broadcast %24 : vector<1x128xf32> to vector<256x128xf32>
    %26 = arith.addf %23, %25 : vector<256x128xf32>
    %cst_23 = arith.constant dense<0xFF800000> : vector<256xf32>
    %27 = vector.multi_reduction <maximumf>, %26, %cst_23 [1] : vector<256x128xf32> to vector<256xf32>
    %28 = vector.shape_cast %27 : vector<256xf32> to vector<256x1xf32>
    %29 = vector.broadcast %28 : vector<256x1xf32> to vector<256x128xf32>
    %30 = arith.subf %26, %29 : vector<256x128xf32>
    %31 = math.exp %30 : vector<256x128xf32>
    %cst_24 = arith.constant dense<0.000000e+00> : vector<256xf32>
    %32 = vector.multi_reduction <add>, %31, %cst_24 [1] : vector<256x128xf32> to vector<256xf32>
    %33 = vector.shape_cast %32 : vector<256xf32> to vector<256x1xf32>
    %34 = tpu.reciprocal %33 {approx = true} : vector<256x1xf32> -> vector<256x1xf32>
    %35 = vector.broadcast %34 : vector<256x1xf32> to vector<256x128xf32>
    %36 = arith.mulf %31, %35 : vector<256x128xf32>
    %c0_25 = arith.constant 0 : index
    %c0_26 = arith.constant 0 : index
    %37 = vector.load %arg10[%c0_25, %c0_26] : memref<256x128xf32, #tpu.memory_space<vmem>>, vector<256x128xf32>
    tpu.vector_store %arg10[%c0_25, %c0_26], %36 {strides = array<i32>} : memref<256x128xf32, #tpu.memory_space<vmem>>, vector<256x128xf32>,
    return
  }
  func.func @transform_0(%arg0: i32) -> (i32, i32) {
    %c0_i32 = arith.constant 0 : i32
    %c0_i32_0 = arith.constant 0 : i32
    return %arg0, %c0_i32 : i32, i32
  }
  func.func @transform_1(%arg0: i32) -> (i32, i32) {
    %c0_i32 = arith.constant 0 : i32
    %c0_i32_0 = arith.constant 0 : i32
    %c0_i32_1 = arith.constant 0 : i32
    return %c0_i32, %c0_i32_0 : i32, i32
  }
  func.func @transform_2(%arg0: i32) -> (i32, i32) {
    %c0_i32 = arith.constant 0 : i32
    %c0_i32_0 = arith.constant 0 : i32
    %c0_i32_1 = arith.constant 0 : i32
    return %c0_i32, %c0_i32_0 : i32, i32
  }
  func.func @transform_3(%arg0: i32) -> (i32, i32) {
    %c0_i32 = arith.constant 0 : i32
    %c0_i32_0 = arith.constant 0 : i32
    %c0_i32_1 = arith.constant 0 : i32
    return %c0_i32, %c0_i32_0 : i32, i32
  }
  func.func @transform_4(%arg0: i32) -> (i32, i32) {
    %c0_i32 = arith.constant 0 : i32
    %c0_i32_0 = arith.constant 0 : i32
    %c0_i32_1 = arith.constant 0 : i32
    return %c0_i32, %c0_i32_0 : i32, i32
  }
  func.func @transform_5(%arg0: i32) -> (i32, i32) {
    %c0_i32 = arith.constant 0 : i32
    %c0_i32_0 = arith.constant 0 : i32
    %c0_i32_1 = arith.constant 0 : i32
    return %c0_i32, %c0_i32_0 : i32, i32
  }
  func.func @transform_6(%arg0: i32) -> (i32, i32) {
    %c0_i32 = arith.constant 0 : i32
    %c0_i32_0 = arith.constant 0 : i32
    %c0_i32_1 = arith.constant 0 : i32
    return %c0_i32, %c0_i32_0 : i32, i32
  }
  func.func @transform_7(%arg0: i32) -> (i32, i32) {
    %c0_i32 = arith.constant 0 : i32
    %c0_i32_0 = arith.constant 0 : i32
    %c0_i32_1 = arith.constant 0 : i32
    return %c0_i32, %c0_i32_0 : i32, i32
  }
  func.func @transform_8(%arg0: i32) -> (i32, i32) {
    %c0_i32 = arith.constant 0 : i32
    %c0_i32_0 = arith.constant 0 : i32
    %c0_i32_1 = arith.constant 0 : i32
    return %c0_i32, %c0_i32_0 : i32, i32
  }
  func.func @transform_9(%arg0: i32) -> (i32, i32) {
    %c0_i32 = arith.constant 0 : i32
    %c0_i32_0 = arith.constant 0 : i32
    return %arg0, %c0_i32 : i32, i32
  }
}

</mosaic_0001>

<bundles_post_ra>
// kernel: tpu_custom_call.1
= control target key start
LH: loop header
LB: loop body
LE: loop exit
PB: predicated region body
PF: predicated region fallthrough
CT: control target
= control target key end

     0   :  { %14 = vsyncpa [#allocation3], 0  ;;  %s3754_s0 = inlined_call_operand.vmem [shape: f32[512,9], index: 0, kind: input, shape index: {}]   ;;  %s3755_s1 = inlined_call_operand.vmem [shape: f32[9,128], index: 1, kind: input, shape index: {}]   ;;  %s3756_s2 = inlined_call_operand.vmem [shape: f32[1,128], index: 2, kind: input, shape index: {}]   ;;  %s3757_s3 = inlined_call_operand.vmem [shape: f32[128,64], index: 3, kind: input, shape index: {}]   ;;  %s3758_s4 = inlined_call_operand.vmem [shape: f32[1,64], index: 4, kind: input, shape index: {}]   ;;  %s3759_s5 = inlined_call_operand.vmem [shape: f32[64,32], index: 5, kind: input, shape index: {}]   ;;  %s3760_s6 = inlined_call_operand.vmem [shape: f32[1,32], index: 6, kind: input, shape index: {}]   ;;  %s3761_s7 = inlined_call_operand.vmem [shape: f32[32,128], index: 7, kind: input, shape index: {}]   ;;  %s3762_s8 = inlined_call_operand.vmem [shape: f32[1,128], index: 8, kind: input, shape index: {}]   ;;  %s3763_s9 = inlined_call_operand.hbm [shape: f32[512,128], index: 9, kind: output, shape index: {}]  }
   0x1   :  { %16 = vsyncpa [#allocation3 + $0x1], 0  ;;  %s2989_s30 = smov 0   ;;  %s2991_s10 = smov 0  }
   0x2   :  { %s2993_s11 = smov 0   ;;  %s2995_s12 = smov 0  }
   0x3 LB: > { %s3010_s13 = sadd.s32 4294967295, %s2933_s12   ;;  %s2111_s14 = sadd.s32 4294967294, %s2933_s12   ;;  %s2933_s12 = sphi %s2995_s12, %s3769_s12   ;;  %s2929_s11 = sphi %s2993_s11, %s3768_s11   ;;  %s2925_s10 = sphi %s2991_s10, %s3767_s10   ;;  %s2921_s30 = sphi %s2989_s30, %s3766_s30  }
   0x4   : > { %s3014_s15 = sadd.s32 1, %s2933_s12   ;;  %s223_s16 = sadd.s32 1, %s2929_s11 }
   0x5   : > { %s220_s17 = ssub.s32 %s2933_s12, %s3014_s15  ;;  %p233_p0 = scmp.ne.s32.totalorder %s2929_s11, %s2925_s10 }
   0x6   : > { %p221_p1 = scmp.eq.s32.totalorder %s220_s17, 0  ;;  %p234_p2 = scmp.eq.s32.totalorder %s3010_s13, 1 }
   0x7   : > { %p239_p3 = scmp.ne.s32.totalorder %s2925_s10, %s2921_s30  ;;  %p240_p4 = scmp.eq.s32.totalorder %s2111_s14, 1 }
   0x8   : > { %s3025_s18 = scalar_select %p221_p1, %s2929_s11, %s223_s16  }
   0x9   : > { %p3027_p5 = por %p234_p2, %p233_p0  ;;  %p3031_p6 = por %p240_p4, %p239_p3 }
   0xa   : > { %p2114_p7 = scmp.ge.s32.totalorder %s2933_s12, 1  ;;  %p291_p8 = scmp.lt.s32.totalorder %s2933_s12, 3 }
   0xc   : > { %p292_p9 = pnand %p2114_p7, %p291_p8 }
   0xd   : > { %v366_v0 = vld [vmem:[%s3755_s1] sm:$0xff] (!%p292_p9)  ;;  %v367_v1 = vld [vmem:[%s3755_s1 + $0x8] sm:$0x1] (!%p292_p9)  ;;  %vm472_vm0 = vcmask (!%p292_p9), 1040384   ;;  %s2116_s25 = sshll.u32 (!%p292_p9), %s3010_s13, 5  ;;  %vm2935_vm1 = vmmov (!%p292_p9), 1  }
   0xe   : > { %295 = sbr.rel (%p292_p9) target bundleno = 1286 (0x506), region = 56  ;;  %v2635_v2 = vpack.c.bf16 (!%p292_p9), %v367_v1, %v366_v0  ;;  %vm2636_vm2 = vmpackc.low (!%p292_p9), %vm472_vm0, %vm2935_vm1  ;;  %p328_p10 = scmp.lt.s32.totalorder (!%p292_p9), %s2116_s25, 63  ;;  %v733_v3 = vld [vmem:[%s3757_s3] sm:$0xff] (!%p292_p9)  ;;  %v734_v4 = vld [vmem:[%s3757_s3 + $0x8] sm:$0xff] (!%p292_p9)  ;;  %vm375_vm3 = vcmask (!%p292_p9), 72704   ;;  %vm1028_vm4 = vcmask (!%p292_p9), 523264  }
   0xf   : > { %v2641_v5 = vpack.c.bf16 (!%p292_p9), %v734_v4, %v733_v3  ;;  %v735_v6 = vld [vmem:[%s3757_s3 + $0x10] sm:$0xff] (!%p292_p9)  ;;  %v736_v7 = vld [vmem:[%s3757_s3 + $0x18] sm:$0xff] (!%p292_p9)  ;;  %v737_v9 = vld [vmem:[%s3757_s3 + $0x20] sm:$0xff] (!%p292_p9)  ;;  %vm1393_vm5 = vcmask (!%p292_p9), 261120   ;;  %s324_s23 = sand.u32 (!%p292_p9), 1, %s2925_s10   ;;  %s2936_s21 = smov (!%p292_p9), [#allocation2]  }
  0x10   : > { %2637 = vmatprep.subr.msk.bf16.mxu0 (!%p292_p9), %vm2636_vm2, %v2635_v2  ;;  %v2645_v8 = vpack.c.bf16 (!%p292_p9), %v736_v7, %v735_v6  ;;  %v738_v10 = vld [vmem:[%s3757_s3 + $0x28] sm:$0xff] (!%p292_p9)  ;;  %v739_v12 = vld [vmem:[%s3757_s3 + $0x30] sm:$0xff] (!%p292_p9)  ;;  %v740_v13 = vld [vmem:[%s3757_s3 + $0x38] sm:$0xff] (!%p292_p9)  ;;  %s2115_s24 = sshll.u32 (!%p292_p9), %s324_s23, 8 }
  0x11   : > { %2640 = vmatpush3.bf16.msk.msra.mxu0 (!%p292_p9), %vm2636_vm2, %v2635_v2  ;;  %2642 = vmatprep.subr.bf16.mxu1 (!%p292_p9), %v2641_v5  ;;  %v2649_v11 = vpack.c.bf16 (!%p292_p9), %v738_v10, %v737_v9  ;;  %v2653_v18 = vpack.c.bf16 (!%p292_p9), %v740_v13, %v739_v12  ;;  %v741_v20 = vld [vmem:[%s3757_s3 + $0x40] sm:$0xff] (!%p292_p9)  ;;  %v742_v21 = vld [vmem:[%s3757_s3 + $0x48] sm:$0xff] (!%p292_p9)  ;;  %v743_v25 = vld [vmem:[%s3757_s3 + $0x50] sm:$0xff] (!%p292_p9)  ;;  %s3637_s26 = scalar_lea.vmem (!%p292_p9), [#allocation2], %s2115_s24 }
  0x12   : > { %2644 = vmatpush3.bf16.msra.mxu1 (!%p292_p9), %v2641_v5  ;;  %v2657_v23 = vpack.c.bf16 (!%p292_p9), %v742_v21, %v741_v20  ;;  %v744_v26 = vld [vmem:[%s3757_s3 + $0x58] sm:$0xff] (!%p292_p9)  ;;  %v745_v30 = vld [vmem:[%s3757_s3 + $0x60] sm:$0xff] (!%p292_p9)  ;;  %v746_v31 = vld [vmem:[%s3757_s3 + $0x68] sm:$0xff] (!%p292_p9)  ;;  %s2049_s28 = sshll.u32 (!%p292_p9), %s3637_s26, 4  ;;  %s3706_s28 = int_to_ptr.vmem [resolvable:$true] %s2049_s28 }
  0x13   : > { %2646 = vmatprep.subr.bf16.mxu1 (!%p292_p9), %v2645_v8  ;;  %v2661_v28 = vpack.c.bf16 (!%p292_p9), %v744_v26, %v743_v25  ;;  %v2665_v33 = vpack.c.bf16 (!%p292_p9), %v746_v31, %v745_v30  ;;  %v747_v56 = vld [vmem:[%s3757_s3 + $0x70] sm:$0xff] (!%p292_p9)  ;;  %v748_v57 = vld [vmem:[%s3757_s3 + $0x78] sm:$0xff] (!%p292_p9)  ;;  %v1013_v59 = vld [vmem:[%s3759_s5] sm:$0xff] (!%p292_p9) }
  0x14   : > { %v2669_v58 = vpack.c.bf16 (!%p292_p9), %v748_v57, %v747_v56  ;;  %v1014_v60 = vld [vmem:[%s3759_s5 + $0x8] sm:$0xff] (!%p292_p9)  ;;  %v1015_v61 = vld [vmem:[%s3759_s5 + $0x10] sm:$0xff] (!%p292_p9)  ;;  %v1016_v63 = vld [vmem:[%s3759_s5 + $0x18] sm:$0xff] (!%p292_p9) }
  0x15   : > { %s3771_s25 = smov (!%p328_p10, %s2116_s25), 63  ;;  %v2673_v62 = vpack.c.bf16 %v1014_v60, %v1013_v59  ;;  %v2677_v0 = vpack.c.bf16 %v1016_v63, %v1015_v61  ;;  %v1017_v1 = vld [vmem:[%s3759_s5 + $0x20] sm:$0xff]  ;;  %v1018_v2 = vld [vmem:[%s3759_s5 + $0x28] sm:$0xff]  ;;  %v1019_v4 = vld [vmem:[%s3759_s5 + $0x30] sm:$0xff] }
  0x16   : > { %s2117_s27 = sshll.u32 %s3771_s25, 3  ;;  %2648 = vmatpush3.bf16.msra.mxu1 %v2645_v8  ;;  %v2681_v3 = vpack.c.bf16 %v1018_v2, %v1017_v1  ;;  %v1020_v5 = vld [vmem:[%s3759_s5 + $0x38] sm:$0xff]  ;;  %v3188_v7 = vld [vmem:[%s3756_s2] ss:$0 sm:$0xff]  ;;  %s2875_s25 = sshll.u32 %s2936_s21, 4  ;;  %s2876_s25 = int_to_ptr.vmem [resolvable:$false] %s2875_s25 }
  0x17   : > { %s3065_s14 = scalar_lea.vmem %s3754_s0, %s2117_s27  ;;  %2650 = vmatprep.subr.bf16.mxu1 %v2649_v11  ;;  %2674 = vmatprep.subr.bf16.mxu0 %v2673_v62  ;;  %v2685_v6 = vpack.c.bf16 %v1020_v5, %v1019_v4  ;;  %s2224_s27 = sshll.u32 %s3010_s13, 12 }
  0x18   : > { %v334_v14 = vld [vmem:[%s3065_s14] sm:$0xff]  ;;  %v335_v15 = vld [vmem:[%s3065_s14 + $0x8] sm:$0xff]  ;;  %v336_v16 = vld [vmem:[%s3065_s14 + $0x10] sm:$0xff]  ;;  %s3704_s17 = scalar_lea.hbm %s3763_s9, %s2224_s27  ;;  %s3713_s13 = scalar_lea.sflag [#allocation3], %s324_s23 }
  0x19   : > { %2387 = vmatprep.mubr.msk.f32.mxu0 %vm375_vm3, %v334_v14  ;;  %v337_v17 = vld [vmem:[%s3065_s14 + $0x18] sm:$0xff]  ;;  %v338_v19 = vld [vmem:[%s3065_s14 + $0x20] sm:$0xff]  ;;  %v339_v22 = vld [vmem:[%s3065_s14 + $0x28] sm:$0xff]  ;;  %s2877_s22 = scalar_lea.vmem %s2876_s25, 8192  ;;  %p2878_p0 = scmp.lt.s32.totalorder %s3706_s28, %s2876_s25 }
  0x1a   : > { %2388 = vmatmul.mubr.msk.f32.vlgmr.msra.gmra.mrb[0].mxu0 %vm375_vm3, %v335_v15  ;;  %2652 = vmatpush3.bf16.msra.mxu1 %v2649_v11  ;;  %v340_v24 = vld [vmem:[%s3065_s14 + $0x30] sm:$0xff]  ;;  %v341_v27 = vld [vmem:[%s3065_s14 + $0x38] sm:$0xff]  ;;  %v342_v29 = vld [vmem:[%s3065_s14 + $0x40] sm:$0xff] }
  0x1b   : > { %2390 = vmatprep.mubr.msk.f32.mxu0 %vm375_vm3, %v336_v16  ;;  %2654 = vmatprep.subr.bf16.mxu1 %v2653_v18  ;;  %v343_v32 = vld [vmem:[%s3065_s14 + $0x48] sm:$0xff]  ;;  %v344_v34 = vld [vmem:[%s3065_s14 + $0x50] sm:$0xff]  ;;  %v345_v35 = vld [vmem:[%s3065_s14 + $0x58] sm:$0xff] }
  0x1c   : > { %v346_v36 = vld [vmem:[%s3065_s14 + $0x60] sm:$0xff]  ;;  %v347_v37 = vld [vmem:[%s3065_s14 + $0x68] sm:$0xff]  ;;  %v348_v38 = vld [vmem:[%s3065_s14 + $0x70] sm:$0xff]  ;;  %2676 = vmatpush3.bf16.msra.mxu0 %v2673_v62 }
  0x1d   : > { %v349_v39 = vld [vmem:[%s3065_s14 + $0x78] sm:$0xff]  ;;  %v350_v40 = vld [vmem:[%s3065_s14 + $0x80] sm:$0xff]  ;;  %v351_v41 = vld [vmem:[%s3065_s14 + $0x88] sm:$0xff]  ;;  %2678 = vmatprep.subr.bf16.mxu0 %v2677_v0 }
  0x1e   : > { %2391 = vmatmul.mubr.msk.f32.gmra.mrb[2].mxu0 %vm375_vm3, %v337_v17  ;;  %2656 = vmatpush3.bf16.msra.mxu1 %v2653_v18  ;;  %v352_v42 = vld [vmem:[%s3065_s14 + $0x90] sm:$0xff]  ;;  %v353_v43 = vld [vmem:[%s3065_s14 + $0x98] sm:$0xff]  ;;  %v354_v44 = vld [vmem:[%s3065_s14 + $0xa0] sm:$0xff] }
  0x1f   : > { %2393 = vmatprep.mubr.msk.f32.mxu0 %vm375_vm3, %v338_v19  ;;  %2658 = vmatprep.subr.bf16.mxu1 %v2657_v23  ;;  %v355_v45 = vld [vmem:[%s3065_s14 + $0xa8] sm:$0xff]  ;;  %v356_v46 = vld [vmem:[%s3065_s14 + $0xb0] sm:$0xff]  ;;  %v357_v47 = vld [vmem:[%s3065_s14 + $0xb8] sm:$0xff] }
  0x20   : > { %v358_v48 = vld [vmem:[%s3065_s14 + $0xc0] sm:$0xff]  ;;  %v359_v49 = vld [vmem:[%s3065_s14 + $0xc8] sm:$0xff]  ;;  %v360_v50 = vld [vmem:[%s3065_s14 + $0xd0] sm:$0xff]  ;;  %2680 = vmatpush3.bf16.msra.mxu0 %v2677_v0 }
  0x21   : > { %v361_v51 = vld [vmem:[%s3065_s14 + $0xd8] sm:$0xff]  ;;  %v362_v52 = vld [vmem:[%s3065_s14 + $0xe0] sm:$0xff]  ;;  %v363_v53 = vld [vmem:[%s3065_s14 + $0xe8] sm:$0xff]  ;;  %2682 = vmatprep.subr.bf16.mxu0 %v2681_v3 }
  0x22   : > { %2394 = vmatmul.mubr.msk.f32.gmra.mrb[4].mxu0 %vm375_vm3, %v339_v22  ;;  %2660 = vmatpush3.bf16.msra.mxu1 %v2657_v23  ;;  %v364_v54 = vld [vmem:[%s3065_s14 + $0xf0] sm:$0xff]  ;;  %v365_v55 = vld [vmem:[%s3065_s14 + $0xf8] sm:$0xff]  ;;  %s2871_s14 = scalar_lea.vmem %s3706_s28, 4096 }
  0x23   : > { %2396 = vmatprep.mubr.msk.f32.mxu0 %vm375_vm3, %v340_v24  ;;  %2662 = vmatprep.subr.bf16.mxu1 %v2661_v28  ;;  %p2872_p11 = scmp.ne.s32.totalorder %s3706_s28, %s2871_s14  ;;  %p2879_p1 = scmp.lt.s32.totalorder %s2877_s22, %s2871_s14 }
  0x24   : > { %2684 = vmatpush3.bf16.msra.mxu0 %v2681_v3 }
  0x25   : > { %2686 = vmatprep.subr.bf16.mxu0 %v2685_v6  ;;  %p2873_p12 = pnand %p2872_p11, %p3027_p5  ;;  %p2880_p2 = por %p2879_p1, %p2878_p0 }
  0x26   : > { %2397 = vmatmul.mubr.msk.f32.gmra.mrb[6].mxu0 %vm375_vm3, %v341_v27  ;;  %2664 = vmatpush3.bf16.msra.mxu1 %v2661_v28 }
  0x27   : > { %2399 = vmatprep.mubr.msk.f32.mxu0 %vm375_vm3, %v342_v29  ;;  %2666 = vmatprep.subr.bf16.mxu1 %v2665_v33  ;;  %p2874_p13 = pneg %p2873_p12 }
  0x28   : > { %2688 = vmatpush3.bf16.msra.mxu0 %v2685_v6 }
  0x29   : > { %p2881_p3 = pnand %p2880_p2, %p2874_p13 }
  0x2a   : > { %2400 = vmatmul.mubr.msk.f32.gmra.mrb[8].mxu0 %vm375_vm3, %v343_v32  ;;  %2668 = vmatpush3.bf16.msra.mxu1 %v2665_v33 }
  0x2b   : > { %2402 = vmatprep.mubr.msk.f32.mxu0 %vm375_vm3, %v344_v34  ;;  %2670 = vmatprep.subr.bf16.mxu1 %v2669_v58 }
  0x2e   : > { %2403 = vmatmul.mubr.msk.f32.gmra.mrb[10].mxu0 %vm375_vm3, %v345_v35  ;;  %2672 = vmatpush3.bf16.msra.mxu1 %v2669_v58 }
  0x2f   : > { %2405 = vmatprep.mubr.msk.f32.mxu0 %vm375_vm3, %v346_v36 }
  0x32   : > { %2406 = vmatmul.mubr.msk.f32.gmra.mrb[12].mxu0 %vm375_vm3, %v347_v37 }
  0x33   : > { %2408 = vmatprep.mubr.msk.f32.mxu0 %vm375_vm3, %v348_v38 }
  0x36   : > { %2409 = vmatmul.mubr.msk.f32.gmra.mrb[14].mxu0 %vm375_vm3, %v349_v39 }
  0x37   : > { %2411 = vmatprep.mubr.msk.f32.mxu0 %vm375_vm3, %v350_v40 }
  0x3a   : > { %2412 = vmatmul.mubr.msk.f32.gmra.mrb[16].mxu0 %vm375_vm3, %v351_v41 }
  0x3b   : > { %2414 = vmatprep.mubr.msk.f32.mxu0 %vm375_vm3, %v352_v42 }
  0x3e   : > { %2415 = vmatmul.mubr.msk.f32.gmra.mrb[18].mxu0 %vm375_vm3, %v353_v43 }
  0x3f   : > { %2417 = vmatprep.mubr.msk.f32.mxu0 %vm375_vm3, %v354_v44 }
  0x42   : > { %2418 = vmatmul.mubr.msk.f32.gmra.mrb[20].mxu0 %vm375_vm3, %v355_v45 }
  0x43   : > { %2420 = vmatprep.mubr.msk.f32.mxu0 %vm375_vm3, %v356_v46 }
  0x46   : > { %2421 = vmatmul.mubr.msk.f32.gmra.mrb[22].mxu0 %vm375_vm3, %v357_v47 }
  0x47   : > { %2423 = vmatprep.mubr.msk.f32.mxu0 %vm375_vm3, %v358_v48 }
  0x4a   : > { %2424 = vmatmul.mubr.msk.f32.gmra.mrb[24].mxu0 %vm375_vm3, %v359_v49 }
  0x4b   : > { %2426 = vmatprep.mubr.msk.f32.mxu0 %vm375_vm3, %v360_v50 }
  0x4e   : > { %2427 = vmatmul.mubr.msk.f32.gmra.mrb[26].mxu0 %vm375_vm3, %v361_v51 }
  0x4f   : > { %2429 = vmatprep.mubr.msk.f32.mxu0 %vm375_vm3, %v362_v52 }
  0x52   : > { %2430 = vmatmul.mubr.msk.f32.gmra.mrb[28].mxu0 %vm375_vm3, %v363_v53 }
  0x53   : > { %2432 = vmatprep.mubr.msk.f32.mxu0 %vm375_vm3, %v364_v54 }
  0x56   : > { %2433 = vmatmul.mubr.msk.f32.gmra.mrb[30].mxu0 %vm375_vm3, %v365_v55 }
  0xed   : > { %v2389_v8 = vpop.f32.mrb[0].mxu0 }
  0xee   : > { %v548_v9 = vadd.f32 %v2389_v8, %v3188_v7  ;;  %v542_v10 = vpop.f32.mrb[1].mxu0 }
  0xef   : > { %v543_v11 = vadd.f32 %v3188_v7, %v542_v10 }
  0xf0   : > { %v702_v14 = vmax.f32 %v548_v9, 0.0 }
  0xf1   : > { %v2392_v12 = vpop.f32.mrb[2].mxu0  ;;  %v701_v13 = vmax.f32 %v543_v11, 0.0 }
  0xf2   : > { %v558_v15 = vadd.f32 %v2392_v12, %v3188_v7  ;;  %v552_v16 = vpop.f32.mrb[3].mxu0 }
  0xf3   : > { %v553_v17 = vadd.f32 %v3188_v7, %v552_v16  ;;  %2467 = vmatprep.mubr.f32.mxu1 %v701_v13 }
  0xf4   : > { %2468 = vmatmul.mubr.f32.vlgmr.msra.gmra.mrb[0].mxu1 %v702_v14  ;;  %v704_v20 = vmax.f32 %v558_v15, 0.0 }
  0xf5   : > { %v703_v18 = vmax.f32 %v553_v17, 0.0  ;;  %v2395_v19 = vpop.f32.mrb[4].mxu0 }
  0xf6   : > { %v568_v21 = vadd.f32 %v2395_v19, %v3188_v7  ;;  %v562_v22 = vpop.f32.mrb[5].mxu0 }
  0xf7   : > { %v563_v23 = vadd.f32 %v3188_v7, %v562_v22  ;;  %2470 = vmatprep.mubr.f32.mxu1 %v703_v18 }
  0xf8   : > { %v706_v24 = vmax.f32 %v568_v21, 0.0  ;;  %2471 = vmatmul.mubr.f32.gmra.mrb[2].mxu1 %v704_v20 }
  0xf9   : > { %v705_v25 = vmax.f32 %v563_v23, 0.0  ;;  %v2398_v26 = vpop.f32.mrb[6].mxu0 }
  0xfa   : > { %v578_v27 = vadd.f32 %v2398_v26, %v3188_v7  ;;  %v572_v28 = vpop.f32.mrb[7].mxu0 }
  0xfb   : > { %v573_v29 = vadd.f32 %v3188_v7, %v572_v28  ;;  %2473 = vmatprep.mubr.f32.mxu1 %v705_v25 }
  0xfc   : > { %v708_v30 = vmax.f32 %v578_v27, 0.0  ;;  %2474 = vmatmul.mubr.f32.gmra.mrb[4].mxu1 %v706_v24 }
  0xfd   : > { %v707_v31 = vmax.f32 %v573_v29, 0.0  ;;  %v2401_v32 = vpop.f32.mrb[8].mxu0 }
  0xfe   : > { %v588_v33 = vadd.f32 %v2401_v32, %v3188_v7  ;;  %v582_v34 = vpop.f32.mrb[9].mxu0 }
  0xff   : > { %v583_v35 = vadd.f32 %v3188_v7, %v582_v34  ;;  %2476 = vmatprep.mubr.f32.mxu1 %v707_v31 }
 0x100   : > { %v710_v36 = vmax.f32 %v588_v33, 0.0  ;;  %2477 = vmatmul.mubr.f32.gmra.mrb[6].mxu1 %v708_v30 }
 0x101   : > { %v709_v37 = vmax.f32 %v583_v35, 0.0  ;;  %v2404_v38 = vpop.f32.mrb[10].mxu0 }
 0x102   : > { %v598_v39 = vadd.f32 %v2404_v38, %v3188_v7  ;;  %v592_v40 = vpop.f32.mrb[11].mxu0 }
 0x103   : > { %v593_v41 = vadd.f32 %v3188_v7, %v592_v40  ;;  %2479 = vmatprep.mubr.f32.mxu1 %v709_v37 }
 0x104   : > { %v712_v42 = vmax.f32 %v598_v39, 0.0  ;;  %2480 = vmatmul.mubr.f32.gmra.mrb[8].mxu1 %v710_v36 }
 0x105   : > { %v711_v43 = vmax.f32 %v593_v41, 0.0  ;;  %v2407_v44 = vpop.f32.mrb[12].mxu0  ;;  %v1382_v41 = vld [vmem:[%s3761_s7] sm:$0xff] }
 0x106   : > { %v608_v45 = vadd.f32 %v2407_v44, %v3188_v7  ;;  %v602_v46 = vpop.f32.mrb[13].mxu0 }
 0x107   : > { %v603_v47 = vadd.f32 %v3188_v7, %v602_v46  ;;  %2482 = vmatprep.mubr.f32.mxu1 %v711_v43  ;;  %v1384_v43 = vld [vmem:[%s3761_s7 + $0x10] sm:$0xff]  ;;  %v3237_v46 = vld [vmem:[%s3758_s4] ss:$0 sm:$0xff] }
 0x108   : > { %v714_v48 = vmax.f32 %v608_v45, 0.0  ;;  %2483 = vmatmul.mubr.f32.gmra.mrb[10].mxu1 %v712_v42  ;;  %v1383_v42 = vld [vmem:[%s3761_s7 + $0x8] sm:$0xff] }
 0x109   : > { %v713_v49 = vmax.f32 %v603_v47, 0.0  ;;  %v2410_v50 = vpop.f32.mrb[14].mxu0  ;;  %v2689_v44 = vpack.c.bf16 %v1383_v42, %v1382_v41 }
 0x10a   : > { %v618_v51 = vadd.f32 %v2410_v50, %v3188_v7  ;;  %v612_v52 = vpop.f32.mrb[15].mxu0 }
 0x10b   : > { %v613_v53 = vadd.f32 %v3188_v7, %v612_v52  ;;  %2485 = vmatprep.mubr.f32.mxu1 %v713_v49  ;;  %2690 = vmatprep.subr.bf16.mxu0 %v2689_v44 }
 0x10c   : > { %v716_v54 = vmax.f32 %v618_v51, 0.0  ;;  %2486 = vmatmul.mubr.f32.gmra.mrb[12].mxu1 %v714_v48  ;;  %2697 = vmatprep.subr.bf16.mxu1 %v2689_v44 }
 0x10d   : > { %v715_v55 = vmax.f32 %v613_v53, 0.0  ;;  %v2413_v56 = vpop.f32.mrb[16].mxu0  ;;  %2699 = vmatpush3.bf16.msra.mxu1 %v2689_v44 }
 0x10e   : > { %v628_v57 = vadd.f32 %v2413_v56, %v3188_v7  ;;  %v622_v58 = vpop.f32.mrb[17].mxu0 }
 0x10f   : > { %v623_v59 = vadd.f32 %v3188_v7, %v622_v58  ;;  %2488 = vmatprep.mubr.f32.mxu1 %v715_v55 }
 0x110   : > { %v718_v60 = vmax.f32 %v628_v57, 0.0  ;;  %2489 = vmatmul.mubr.f32.gmra.mrb[14].mxu1 %v716_v54 }
 0x111   : > { %v717_v61 = vmax.f32 %v623_v59, 0.0  ;;  %v2416_v62 = vpop.f32.mrb[18].mxu0 }
 0x112   : > { %v638_v63 = vadd.f32 %v2416_v62, %v3188_v7  ;;  %v632_v0 = vpop.f32.mrb[19].mxu0 }
 0x113   : > { %v633_v1 = vadd.f32 %v3188_v7, %v632_v0  ;;  %2491 = vmatprep.mubr.f32.mxu1 %v717_v61 }
 0x114   : > { %v720_v2 = vmax.f32 %v638_v63, 0.0  ;;  %2492 = vmatmul.mubr.f32.gmra.mrb[16].mxu1 %v718_v60 }
 0x115   : > { %v719_v3 = vmax.f32 %v633_v1, 0.0  ;;  %v2419_v4 = vpop.f32.mrb[20].mxu0 }
 0x116   : > { %v648_v5 = vadd.f32 %v2419_v4, %v3188_v7  ;;  %v642_v6 = vpop.f32.mrb[21].mxu0 }
 0x117   : > { %v643_v8 = vadd.f32 %v3188_v7, %v642_v6  ;;  %2494 = vmatprep.mubr.f32.mxu1 %v719_v3 }
 0x118   : > { %v722_v9 = vmax.f32 %v648_v5, 0.0  ;;  %2495 = vmatmul.mubr.f32.gmra.mrb[18].mxu1 %v720_v2 }
 0x119   : > { %v721_v10 = vmax.f32 %v643_v8, 0.0  ;;  %v2422_v11 = vpop.f32.mrb[22].mxu0 }
 0x11a   : > { %v658_v12 = vadd.f32 %v2422_v11, %v3188_v7  ;;  %v652_v13 = vpop.f32.mrb[23].mxu0 }
 0x11b   : > { %v653_v14 = vadd.f32 %v3188_v7, %v652_v13  ;;  %2497 = vmatprep.mubr.f32.mxu1 %v721_v10 }
 0x11c   : > { %v724_v15 = vmax.f32 %v658_v12, 0.0  ;;  %2498 = vmatmul.mubr.f32.gmra.mrb[20].mxu1 %v722_v9 }
 0x11d   : > { %v723_v16 = vmax.f32 %v653_v14, 0.0  ;;  %v2425_v17 = vpop.f32.mrb[24].mxu0 }
 0x11e   : > { %v668_v18 = vadd.f32 %v2425_v17, %v3188_v7  ;;  %v662_v19 = vpop.f32.mrb[25].mxu0 }
 0x11f   : > { %v663_v20 = vadd.f32 %v3188_v7, %v662_v19  ;;  %2500 = vmatprep.mubr.f32.mxu1 %v723_v16 }
 0x120   : > { %v726_v21 = vmax.f32 %v668_v18, 0.0  ;;  %2501 = vmatmul.mubr.f32.gmra.mrb[22].mxu1 %v724_v15 }
 0x121   : > { %v725_v22 = vmax.f32 %v663_v20, 0.0  ;;  %v2428_v23 = vpop.f32.mrb[26].mxu0 }
 0x122   : > { %v678_v24 = vadd.f32 %v2428_v23, %v3188_v7  ;;  %v672_v25 = vpop.f32.mrb[27].mxu0 }
 0x123   : > { %v673_v26 = vadd.f32 %v3188_v7, %v672_v25  ;;  %2503 = vmatprep.mubr.f32.mxu1 %v725_v22 }
 0x124   : > { %v728_v27 = vmax.f32 %v678_v24, 0.0  ;;  %2504 = vmatmul.mubr.f32.gmra.mrb[24].mxu1 %v726_v21 }
 0x125   : > { %v727_v28 = vmax.f32 %v673_v26, 0.0  ;;  %v2431_v29 = vpop.f32.mrb[28].mxu0 }
 0x126   : > { %v688_v30 = vadd.f32 %v2431_v29, %v3188_v7  ;;  %v682_v31 = vpop.f32.mrb[29].mxu0 }
 0x127   : > { %v683_v32 = vadd.f32 %v3188_v7, %v682_v31  ;;  %2506 = vmatprep.mubr.f32.mxu1 %v727_v28 }
 0x128   : > { %v730_v33 = vmax.f32 %v688_v30, 0.0  ;;  %2507 = vmatmul.mubr.f32.gmra.mrb[26].mxu1 %v728_v27 }
 0x129   : > { %v729_v34 = vmax.f32 %v683_v32, 0.0  ;;  %v2434_v35 = vpop.f32.mrb[30].mxu0 }
 0x12a   : > { %v698_v36 = vadd.f32 %v2434_v35, %v3188_v7  ;;  %v692_v37 = vpop.f32.mrb[31].mxu0 }
 0x12b   : > { %v693_v38 = vadd.f32 %v3188_v7, %v692_v37  ;;  %2509 = vmatprep.mubr.f32.mxu1 %v729_v34  ;;  %v1385_v7 = vld [vmem:[%s3761_s7 + $0x18] sm:$0xff] }
 0x12c   : > { %v732_v39 = vmax.f32 %v698_v36, 0.0  ;;  %2510 = vmatmul.mubr.f32.gmra.mrb[28].mxu1 %v730_v33  ;;  %v2693_v45 = vpack.c.bf16 %v1385_v7, %v1384_v43 }
 0x12d   : > { %v731_v40 = vmax.f32 %v693_v38, 0.0 }
 0x12e   : > { %2698 = vmatprep.subr.bf16.mxu1 %v2693_v45 }
 0x12f   : > { %2512 = vmatprep.mubr.f32.mxu1 %v731_v40  ;;  %2700 = vmatpush3.bf16.msra.mxu1 %v2693_v45 }
 0x130   : > { %2513 = vmatmul.mubr.f32.gmra.mrb[30].mxu1 %v732_v39 }
 0x1c7   : > { %v2469_v47 = vpop.f32.mrb[0].mxu1 }
 0x1c8   : > { %v828_v48 = vadd.f32 %v2469_v47, %v3237_v46  ;;  %v822_v49 = vpop.f32.mrb[1].mxu1 }
 0x1c9   : > { %v823_v50 = vadd.f32 %v3237_v46, %v822_v49 }
 0x1ca   : > { %v982_v53 = vmax.f32 %v828_v48, 0.0 }
 0x1cb   : > { %v981_v51 = vmax.f32 %v823_v50, 0.0  ;;  %v2472_v52 = vpop.f32.mrb[2].mxu1 }
 0x1cc   : > { %v838_v54 = vadd.f32 %v2472_v52, %v3237_v46  ;;  %v832_v55 = vpop.f32.mrb[3].mxu1 }
 0x1cd   : > { %v833_v56 = vadd.f32 %v3237_v46, %v832_v55  ;;  %2531 = vmatprep.mubr.msk.f32.mxu0 %vm1028_vm4, %v981_v51 }
 0x1ce   : > { %2532 = vmatmul.mubr.msk.f32.vlgmr.msra.gmra.mrb[32].mxu0 %vm1028_vm4, %v982_v53  ;;  %v984_v59 = vmax.f32 %v838_v54, 0.0 }
 0x1cf   : > { %v983_v57 = vmax.f32 %v833_v56, 0.0  ;;  %v2475_v58 = vpop.f32.mrb[4].mxu1  ;;  %2692 = vmatpush3.bf16.msra.mxu0 %v2689_v44 }
 0x1d0   : > { %v848_v60 = vadd.f32 %v2475_v58, %v3237_v46  ;;  %v842_v61 = vpop.f32.mrb[5].mxu1  ;;  %2694 = vmatprep.subr.bf16.mxu0 %v2693_v45 }
 0x1d1   : > { %v843_v62 = vadd.f32 %v3237_v46, %v842_v61  ;;  %2534 = vmatprep.mubr.msk.f32.mxu0 %vm1028_vm4, %v983_v57 }
 0x1d2   : > { %v986_v63 = vmax.f32 %v848_v60, 0.0  ;;  %2535 = vmatmul.mubr.msk.f32.gmra.mrb[34].mxu0 %vm1028_vm4, %v984_v59 }
 0x1d3   : > { %v985_v0 = vmax.f32 %v843_v62, 0.0  ;;  %v2478_v1 = vpop.f32.mrb[6].mxu1  ;;  %2696 = vmatpush3.bf16.msra.mxu0 %v2693_v45 }
 0x1d4   : > { %v858_v2 = vadd.f32 %v2478_v1, %v3237_v46  ;;  %v852_v3 = vpop.f32.mrb[7].mxu1 }
 0x1d5   : > { %v853_v4 = vadd.f32 %v3237_v46, %v852_v3  ;;  %2537 = vmatprep.mubr.msk.f32.mxu0 %vm1028_vm4, %v985_v0 }
 0x1d6   : > { %v988_v5 = vmax.f32 %v858_v2, 0.0  ;;  %2538 = vmatmul.mubr.msk.f32.gmra.mrb[36].mxu0 %vm1028_vm4, %v986_v63 }
 0x1d7   : > { %v987_v6 = vmax.f32 %v853_v4, 0.0  ;;  %v2481_v8 = vpop.f32.mrb[8].mxu1 }
 0x1d8   : > { %v868_v9 = vadd.f32 %v2481_v8, %v3237_v46  ;;  %v862_v10 = vpop.f32.mrb[9].mxu1 }
 0x1d9   : > { %v863_v11 = vadd.f32 %v3237_v46, %v862_v10  ;;  %2540 = vmatprep.mubr.msk.f32.mxu0 %vm1028_vm4, %v987_v6 }
 0x1da   : > { %v990_v12 = vmax.f32 %v868_v9, 0.0  ;;  %2541 = vmatmul.mubr.msk.f32.gmra.mrb[38].mxu0 %vm1028_vm4, %v988_v5 }
 0x1db   : > { %v989_v13 = vmax.f32 %v863_v11, 0.0  ;;  %v2484_v14 = vpop.f32.mrb[10].mxu1 }
 0x1dc   : > { %v878_v15 = vadd.f32 %v2484_v14, %v3237_v46  ;;  %v872_v16 = vpop.f32.mrb[11].mxu1 }
 0x1dd   : > { %v873_v17 = vadd.f32 %v3237_v46, %v872_v16  ;;  %2543 = vmatprep.mubr.msk.f32.mxu0 %vm1028_vm4, %v989_v13 }
 0x1de   : > { %v992_v18 = vmax.f32 %v878_v15, 0.0  ;;  %2544 = vmatmul.mubr.msk.f32.gmra.mrb[40].mxu0 %vm1028_vm4, %v990_v12 }
 0x1df   : > { %v991_v19 = vmax.f32 %v873_v17, 0.0  ;;  %v2487_v20 = vpop.f32.mrb[12].mxu1  ;;  %v3306_v17 = vld [vmem:[%s3760_s6] ss:$0 sm:$0xff] }
 0x1e0   : > { %v888_v21 = vadd.f32 %v2487_v20, %v3237_v46  ;;  %v882_v22 = vpop.f32.mrb[13].mxu1 }
 0x1e1   : > { %v883_v23 = vadd.f32 %v3237_v46, %v882_v22  ;;  %2546 = vmatprep.mubr.msk.f32.mxu0 %vm1028_vm4, %v991_v19 }
 0x1e2   : > { %v994_v24 = vmax.f32 %v888_v21, 0.0  ;;  %2547 = vmatmul.mubr.msk.f32.gmra.mrb[42].mxu0 %vm1028_vm4, %v992_v18 }
 0x1e3   : > { %v993_v25 = vmax.f32 %v883_v23, 0.0  ;;  %v2490_v26 = vpop.f32.mrb[14].mxu1 }
 0x1e4   : > { %v898_v27 = vadd.f32 %v2490_v26, %v3237_v46  ;;  %v892_v28 = vpop.f32.mrb[15].mxu1 }
 0x1e5   : > { %v893_v29 = vadd.f32 %v3237_v46, %v892_v28  ;;  %2549 = vmatprep.mubr.msk.f32.mxu0 %vm1028_vm4, %v993_v25 }
 0x1e6   : > { %v996_v30 = vmax.f32 %v898_v27, 0.0  ;;  %2550 = vmatmul.mubr.msk.f32.gmra.mrb[44].mxu0 %vm1028_vm4, %v994_v24 }
 0x1e7   : > { %v995_v31 = vmax.f32 %v893_v29, 0.0  ;;  %v2493_v32 = vpop.f32.mrb[16].mxu1 }
 0x1e8   : > { %v908_v33 = vadd.f32 %v2493_v32, %v3237_v46  ;;  %v902_v34 = vpop.f32.mrb[17].mxu1 }
 0x1e9   : > { %v903_v35 = vadd.f32 %v3237_v46, %v902_v34  ;;  %2552 = vmatprep.mubr.msk.f32.mxu0 %vm1028_vm4, %v995_v31 }
 0x1ea   : > { %v998_v36 = vmax.f32 %v908_v33, 0.0  ;;  %2553 = vmatmul.mubr.msk.f32.gmra.mrb[46].mxu0 %vm1028_vm4, %v996_v30 }
 0x1eb   : > { %v997_v37 = vmax.f32 %v903_v35, 0.0  ;;  %v2496_v38 = vpop.f32.mrb[18].mxu1 }
 0x1ec   : > { %v918_v39 = vadd.f32 %v2496_v38, %v3237_v46  ;;  %v912_v40 = vpop.f32.mrb[19].mxu1 }
 0x1ed   : > { %v913_v41 = vadd.f32 %v3237_v46, %v912_v40  ;;  %2555 = vmatprep.mubr.msk.f32.mxu0 %vm1028_vm4, %v997_v37 }
 0x1ee   : > { %v1000_v42 = vmax.f32 %v918_v39, 0.0  ;;  %2556 = vmatmul.mubr.msk.f32.gmra.mrb[48].mxu0 %vm1028_vm4, %v998_v36 }
 0x1ef   : > { %v999_v43 = vmax.f32 %v913_v41, 0.0  ;;  %v2499_v44 = vpop.f32.mrb[20].mxu1 }
 0x1f0   : > { %v928_v7 = vadd.f32 %v2499_v44, %v3237_v46  ;;  %v922_v45 = vpop.f32.mrb[21].mxu1 }
 0x1f1   : > { %v923_v47 = vadd.f32 %v3237_v46, %v922_v45  ;;  %2558 = vmatprep.mubr.msk.f32.mxu0 %vm1028_vm4, %v999_v43 }
 0x1f2   : > { %v1002_v48 = vmax.f32 %v928_v7, 0.0  ;;  %2559 = vmatmul.mubr.msk.f32.gmra.mrb[50].mxu0 %vm1028_vm4, %v1000_v42 }
 0x1f3   : > { %v1001_v49 = vmax.f32 %v923_v47, 0.0  ;;  %v2502_v50 = vpop.f32.mrb[22].mxu1 }
 0x1f4   : > { %v938_v51 = vadd.f32 %v2502_v50, %v3237_v46  ;;  %v932_v52 = vpop.f32.mrb[23].mxu1 }
 0x1f5   : > { %v933_v53 = vadd.f32 %v3237_v46, %v932_v52  ;;  %2561 = vmatprep.mubr.msk.f32.mxu0 %vm1028_vm4, %v1001_v49 }
 0x1f6   : > { %v1004_v54 = vmax.f32 %v938_v51, 0.0  ;;  %2562 = vmatmul.mubr.msk.f32.gmra.mrb[52].mxu0 %vm1028_vm4, %v1002_v48 }
 0x1f7   : > { %v1003_v55 = vmax.f32 %v933_v53, 0.0  ;;  %v2505_v56 = vpop.f32.mrb[24].mxu1 }
 0x1f8   : > { %v948_v57 = vadd.f32 %v2505_v56, %v3237_v46  ;;  %v942_v58 = vpop.f32.mrb[25].mxu1 }
 0x1f9   : > { %v943_v59 = vadd.f32 %v3237_v46, %v942_v58  ;;  %2564 = vmatprep.mubr.msk.f32.mxu0 %vm1028_vm4, %v1003_v55 }
 0x1fa   : > { %v1006_v60 = vmax.f32 %v948_v57, 0.0  ;;  %2565 = vmatmul.mubr.msk.f32.gmra.mrb[54].mxu0 %vm1028_vm4, %v1004_v54 }
 0x1fb   : > { %v1005_v61 = vmax.f32 %v943_v59, 0.0  ;;  %v2508_v62 = vpop.f32.mrb[26].mxu1 }
 0x1fc   : > { %v958_v63 = vadd.f32 %v2508_v62, %v3237_v46  ;;  %v952_v0 = vpop.f32.mrb[27].mxu1 }
 0x1fd   : > { %v953_v1 = vadd.f32 %v3237_v46, %v952_v0  ;;  %2567 = vmatprep.mubr.msk.f32.mxu0 %vm1028_vm4, %v1005_v61 }
 0x1fe   : > { %v1008_v2 = vmax.f32 %v958_v63, 0.0  ;;  %2568 = vmatmul.mubr.msk.f32.gmra.mrb[56].mxu0 %vm1028_vm4, %v1006_v60 }
 0x1ff   : > { %v1007_v3 = vmax.f32 %v953_v1, 0.0  ;;  %v2511_v4 = vpop.f32.mrb[28].mxu1 }
 0x200   : > { %v968_v5 = vadd.f32 %v2511_v4, %v3237_v46  ;;  %v962_v6 = vpop.f32.mrb[29].mxu1 }
 0x201   : > { %v963_v8 = vadd.f32 %v3237_v46, %v962_v6  ;;  %2570 = vmatprep.mubr.msk.f32.mxu0 %vm1028_vm4, %v1007_v3 }
 0x202   : > { %v1010_v9 = vmax.f32 %v968_v5, 0.0  ;;  %2571 = vmatmul.mubr.msk.f32.gmra.mrb[58].mxu0 %vm1028_vm4, %v1008_v2 }
 0x203   : > { %v1009_v10 = vmax.f32 %v963_v8, 0.0  ;;  %v2514_v11 = vpop.f32.mrb[30].mxu1 }
 0x204   : > { %v978_v12 = vadd.f32 %v2514_v11, %v3237_v46  ;;  %v972_v13 = vpop.f32.mrb[31].mxu1 }
 0x205   : > { %v973_v14 = vadd.f32 %v3237_v46, %v972_v13  ;;  %2573 = vmatprep.mubr.msk.f32.mxu0 %vm1028_vm4, %v1009_v10 }
 0x206   : > { %v1012_v15 = vmax.f32 %v978_v12, 0.0  ;;  %2574 = vmatmul.mubr.msk.f32.gmra.mrb[60].mxu0 %vm1028_vm4, %v1010_v9 }
 0x207   : > { %v1011_v16 = vmax.f32 %v973_v14, 0.0 }
 0x209   : > { %2576 = vmatprep.mubr.msk.f32.mxu0 %vm1028_vm4, %v1011_v16 }
 0x20a   : > { %2577 = vmatmul.mubr.msk.f32.gmra.mrb[62].mxu0 %vm1028_vm4, %v1012_v15 }
 0x2a1   : > { %v2533_v18 = vpop.f32.mrb[32].mxu0 }
 0x2a2   : > { %v1197_v19 = vadd.f32 %v2533_v18, %v3306_v17  ;;  %v1191_v20 = vpop.f32.mrb[33].mxu0 }
 0x2a3   : > { %v1192_v46 = vadd.f32 %v3306_v17, %v1191_v20 }
 0x2a4   : > { %v1351_v23 = vmax.f32 %v1197_v19, 0.0 }
 0x2a5   : > { %v1350_v21 = vmax.f32 %v1192_v46, 0.0  ;;  %v2536_v22 = vpop.f32.mrb[34].mxu0 }
 0x2a6   : > { %v1207_v24 = vadd.f32 %v2536_v22, %v3306_v17  ;;  %v1201_v25 = vpop.f32.mrb[35].mxu0 }
 0x2a7   : > { %v1202_v26 = vadd.f32 %v3306_v17, %v1201_v25  ;;  %2587 = vmatprep.mubr.msk.f32.mxu0 %vm1393_vm5, %v1350_v21 }
 0x2a8   : > { %2588 = vmatmul.mubr.msk.f32.vlgmr.msra.gmra.mrb[64].mxu0 %vm1393_vm5, %v1351_v23  ;;  %v1353_v29 = vmax.f32 %v1207_v24, 0.0 }
 0x2a9   : > { %v1352_v27 = vmax.f32 %v1202_v26, 0.0  ;;  %v2539_v28 = vpop.f32.mrb[36].mxu0 }
 0x2aa   : > { %v1217_v30 = vadd.f32 %v2539_v28, %v3306_v17  ;;  %v1211_v31 = vpop.f32.mrb[37].mxu0 }
 0x2ab   : > { %v1212_v32 = vadd.f32 %v3306_v17, %v1211_v31  ;;  %2590 = vmatprep.mubr.msk.f32.mxu0 %vm1393_vm5, %v1352_v27 }
 0x2ac   : > { %2591 = vmatmul.mubr.msk.f32.gmra.mrb[66].mxu0 %vm1393_vm5, %v1353_v29  ;;  %v1355_v35 = vmax.f32 %v1217_v30, 0.0 }
 0x2ad   : > { %v1354_v33 = vmax.f32 %v1212_v32, 0.0  ;;  %v2542_v34 = vpop.f32.mrb[38].mxu0 }
 0x2ae   : > { %v1227_v36 = vadd.f32 %v2542_v34, %v3306_v17  ;;  %v1221_v37 = vpop.f32.mrb[39].mxu0 }
 0x2af   : > { %v1222_v38 = vadd.f32 %v3306_v17, %v1221_v37  ;;  %2593 = vmatprep.mubr.msk.f32.mxu0 %vm1393_vm5, %v1354_v33 }
 0x2b0   : > { %2594 = vmatmul.mubr.msk.f32.gmra.mrb[68].mxu0 %vm1393_vm5, %v1355_v35  ;;  %v1357_v41 = vmax.f32 %v1227_v36, 0.0 }
 0x2b1   : > { %v1356_v39 = vmax.f32 %v1222_v38, 0.0  ;;  %v2545_v40 = vpop.f32.mrb[40].mxu0 }
 0x2b2   : > { %v1237_v42 = vadd.f32 %v2545_v40, %v3306_v17  ;;  %v1231_v43 = vpop.f32.mrb[41].mxu0 }
 0x2b3   : > { %v1232_v44 = vadd.f32 %v3306_v17, %v1231_v43  ;;  %2596 = vmatprep.mubr.msk.f32.mxu1 %vm1393_vm5, %v1356_v39 }
 0x2b4   : > { %2597 = vmatmul.mubr.msk.f32.vlgmr.msra.gmra.mrb[32].mxu1 %vm1393_vm5, %v1357_v41  ;;  %v1359_v47 = vmax.f32 %v1237_v42, 0.0 }
 0x2b5   : > { %v1358_v7 = vmax.f32 %v1232_v44, 0.0  ;;  %v2548_v45 = vpop.f32.mrb[42].mxu0 }
 0x2b6   : > { %v1247_v48 = vadd.f32 %v2548_v45, %v3306_v17  ;;  %v1241_v49 = vpop.f32.mrb[43].mxu0 }
 0x2b7   : > { %v1242_v50 = vadd.f32 %v3306_v17, %v1241_v49  ;;  %2599 = vmatprep.mubr.msk.f32.mxu1 %vm1393_vm5, %v1358_v7 }
 0x2b8   : > { %2600 = vmatmul.mubr.msk.f32.gmra.mrb[34].mxu1 %vm1393_vm5, %v1359_v47  ;;  %v1361_v53 = vmax.f32 %v1247_v48, 0.0 }
 0x2b9   : > { %v1360_v51 = vmax.f32 %v1242_v50, 0.0  ;;  %v2551_v52 = vpop.f32.mrb[44].mxu0  ;;  %v3375_v50 = vld [vmem:[%s3762_s8] ss:$0 sm:$0xff] }
 0x2ba   : > { %v1257_v54 = vadd.f32 %v2551_v52, %v3306_v17  ;;  %v1251_v55 = vpop.f32.mrb[45].mxu0 }
 0x2bb   : > { %v1252_v56 = vadd.f32 %v3306_v17, %v1251_v55  ;;  %2602 = vmatprep.mubr.msk.f32.mxu1 %vm1393_vm5, %v1360_v51 }
 0x2bc   : > { %2603 = vmatmul.mubr.msk.f32.gmra.mrb[36].mxu1 %vm1393_vm5, %v1361_v53  ;;  %v1363_v59 = vmax.f32 %v1257_v54, 0.0 }
 0x2bd   : > { %v1362_v57 = vmax.f32 %v1252_v56, 0.0  ;;  %v2554_v58 = vpop.f32.mrb[46].mxu0 }
 0x2be   : > { %v1267_v60 = vadd.f32 %v2554_v58, %v3306_v17  ;;  %v1261_v61 = vpop.f32.mrb[47].mxu0 }
 0x2bf   : > { %v1262_v62 = vadd.f32 %v3306_v17, %v1261_v61  ;;  %2605 = vmatprep.mubr.msk.f32.mxu1 %vm1393_vm5, %v1362_v57 }
 0x2c0   : > { %2606 = vmatmul.mubr.msk.f32.gmra.mrb[38].mxu1 %vm1393_vm5, %v1363_v59  ;;  %v1365_v1 = vmax.f32 %v1267_v60, 0.0 }
 0x2c1   : > { %v1364_v63 = vmax.f32 %v1262_v62, 0.0  ;;  %v2557_v0 = vpop.f32.mrb[48].mxu0 }
 0x2c2   : > { %v1277_v2 = vadd.f32 %v2557_v0, %v3306_v17  ;;  %v1271_v3 = vpop.f32.mrb[49].mxu0 }
 0x2c3   : > { %v1272_v4 = vadd.f32 %v3306_v17, %v1271_v3  ;;  %2608 = vmatprep.mubr.msk.f32.mxu1 %vm1393_vm5, %v1364_v63 }
 0x2c4   : > { %2609 = vmatmul.mubr.msk.f32.gmra.mrb[40].mxu1 %vm1393_vm5, %v1365_v1  ;;  %v1367_v8 = vmax.f32 %v1277_v2, 0.0 }
 0x2c5   : > { %v1366_v5 = vmax.f32 %v1272_v4, 0.0  ;;  %v2560_v6 = vpop.f32.mrb[50].mxu0 }
 0x2c6   : > { %v1287_v9 = vadd.f32 %v2560_v6, %v3306_v17  ;;  %v1281_v10 = vpop.f32.mrb[51].mxu0 }
 0x2c7   : > { %v1282_v11 = vadd.f32 %v3306_v17, %v1281_v10  ;;  %2611 = vmatprep.mubr.msk.f32.mxu1 %vm1393_vm5, %v1366_v5 }
 0x2c8   : > { %2612 = vmatmul.mubr.msk.f32.gmra.mrb[42].mxu1 %vm1393_vm5, %v1367_v8  ;;  %v1369_v14 = vmax.f32 %v1287_v9, 0.0 }
 0x2c9   : > { %v1368_v12 = vmax.f32 %v1282_v11, 0.0  ;;  %v2563_v13 = vpop.f32.mrb[52].mxu0 }
 0x2ca   : > { %v1297_v15 = vadd.f32 %v2563_v13, %v3306_v17  ;;  %v1291_v16 = vpop.f32.mrb[53].mxu0 }
 0x2cb   : > { %v1292_v18 = vadd.f32 %v3306_v17, %v1291_v16  ;;  %2614 = vmatprep.mubr.msk.f32.mxu1 %vm1393_vm5, %v1368_v12 }
 0x2cc   : > { %2615 = vmatmul.mubr.msk.f32.gmra.mrb[44].mxu1 %vm1393_vm5, %v1369_v14  ;;  %v1371_v46 = vmax.f32 %v1297_v15, 0.0 }
 0x2cd   : > { %v1370_v19 = vmax.f32 %v1292_v18, 0.0  ;;  %v2566_v20 = vpop.f32.mrb[54].mxu0 }
 0x2ce   : > { %v1307_v21 = vadd.f32 %v2566_v20, %v3306_v17  ;;  %v1301_v22 = vpop.f32.mrb[55].mxu0 }
 0x2cf   : > { %v1302_v23 = vadd.f32 %v3306_v17, %v1301_v22  ;;  %2617 = vmatprep.mubr.msk.f32.mxu1 %vm1393_vm5, %v1370_v19 }
 0x2d0   : > { %2618 = vmatmul.mubr.msk.f32.gmra.mrb[46].mxu1 %vm1393_vm5, %v1371_v46  ;;  %v1373_v26 = vmax.f32 %v1307_v21, 0.0 }
 0x2d1   : > { %v1372_v24 = vmax.f32 %v1302_v23, 0.0  ;;  %v2569_v25 = vpop.f32.mrb[56].mxu0 }
 0x2d2   : > { %v1317_v27 = vadd.f32 %v2569_v25, %v3306_v17  ;;  %v1311_v28 = vpop.f32.mrb[57].mxu0 }
 0x2d3   : > { %v1312_v29 = vadd.f32 %v3306_v17, %v1311_v28  ;;  %2620 = vmatprep.mubr.msk.f32.mxu1 %vm1393_vm5, %v1372_v24 }
 0x2d4   : > { %2621 = vmatmul.mubr.msk.f32.gmra.mrb[48].mxu1 %vm1393_vm5, %v1373_v26  ;;  %v1375_v32 = vmax.f32 %v1317_v27, 0.0 }
 0x2d5   : > { %v1374_v30 = vmax.f32 %v1312_v29, 0.0  ;;  %v2572_v31 = vpop.f32.mrb[58].mxu0 }
 0x2d6   : > { %v1327_v33 = vadd.f32 %v2572_v31, %v3306_v17  ;;  %v1321_v34 = vpop.f32.mrb[59].mxu0 }
 0x2d7   : > { %v1322_v35 = vadd.f32 %v3306_v17, %v1321_v34  ;;  %2623 = vmatprep.mubr.msk.f32.mxu1 %vm1393_vm5, %v1374_v30 }
 0x2d8   : > { %2624 = vmatmul.mubr.msk.f32.gmra.mrb[50].mxu1 %vm1393_vm5, %v1375_v32  ;;  %v1377_v38 = vmax.f32 %v1327_v33, 0.0 }
 0x2d9   : > { %v1376_v36 = vmax.f32 %v1322_v35, 0.0  ;;  %v2575_v37 = vpop.f32.mrb[60].mxu0 }
 0x2da   : > { %v1337_v39 = vadd.f32 %v2575_v37, %v3306_v17  ;;  %v1331_v40 = vpop.f32.mrb[61].mxu0 }
 0x2db   : > { %v1332_v41 = vadd.f32 %v3306_v17, %v1331_v40  ;;  %2626 = vmatprep.mubr.msk.f32.mxu1 %vm1393_vm5, %v1376_v36 }
 0x2dc   : > { %2627 = vmatmul.mubr.msk.f32.gmra.mrb[52].mxu1 %vm1393_vm5, %v1377_v38  ;;  %v1379_v44 = vmax.f32 %v1337_v39, 0.0 }
 0x2dd   : > { %v1378_v42 = vmax.f32 %v1332_v41, 0.0  ;;  %v2578_v43 = vpop.f32.mrb[62].mxu0 }
 0x2de   : > { %v1347_v7 = vadd.f32 %v2578_v43, %v3306_v17  ;;  %v1341_v45 = vpop.f32.mrb[63].mxu0 }
 0x2df   : > { %v1342_v47 = vadd.f32 %v3306_v17, %v1341_v45  ;;  %2629 = vmatprep.mubr.msk.f32.mxu1 %vm1393_vm5, %v1378_v42 }
 0x2e0   : > { %2630 = vmatmul.mubr.msk.f32.gmra.mrb[54].mxu1 %vm1393_vm5, %v1379_v44  ;;  %v1381_v49 = vmax.f32 %v1347_v7, 0.0 }
 0x2e1   : > { %v1380_v48 = vmax.f32 %v1342_v47, 0.0 }
 0x2e3   : > { %2632 = vmatprep.mubr.msk.f32.mxu1 %vm1393_vm5, %v1380_v48 }
 0x2e4   : > { %2633 = vmatmul.mubr.msk.f32.gmra.mrb[56].mxu1 %vm1393_vm5, %v1381_v49 }
 0x37b   : > { %v2589_v51 = vpop.f32.mrb[64].mxu0 }
 0x37c   : > { %v3378_v52 = vadd.f32 %v2589_v51, %v3375_v50  ;;  %v1556_v17 = vpop.f32.mrb[65].mxu0 }
 0x37d   : > { %v3382_v54 = vadd.f32 %v3375_v50, %v1556_v17 }
 0x37e   : > { %1717 = vmax.xlane.f32.xlu0 %v3378_v52 }
 0x37f   : > { %v2592_v53 = vpop.f32.mrb[66].mxu0 }
 0x380   : > { %v3385_v55 = vadd.f32 %v2592_v53, %v3375_v50  ;;  %v1566_v56 = vpop.f32.mrb[67].mxu0 }
 0x381   : > { %v3390_v58 = vadd.f32 %v3375_v50, %v1566_v56 }
 0x382   : > { %1721 = vmax.xlane.f32.xlu1 %v3385_v55  ;;  %1715 = vmax.xlane.f32.xlu0 %v3382_v54 }
 0x383   : > { %v2595_v57 = vpop.f32.mrb[68].mxu0 }
 0x384   : > { %v1576_v59 = vpop.f32.mrb[69].mxu0  ;;  %v3398_v62 = vadd.f32 %v2595_v57, %v3375_v50 }
 0x385   : > { %v3393_v60 = vadd.f32 %v3375_v50, %v1576_v59 }
 0x386   : > { %1719 = vmax.xlane.f32.xlu1 %v3390_v58 }
 0x387   : > { %v2598_v61 = vpop.f32.mrb[32].mxu1  ;;  %1723 = vmax.xlane.f32.xlu0 %v3393_v60 }
 0x388   : > { %v1586_v63 = vpop.f32.mrb[33].mxu1  ;;  %v3406_v2 = vadd.f32 %v2598_v61, %v3375_v50 }
 0x389   : > { %v3401_v0 = vadd.f32 %v3375_v50, %v1586_v63 }
 0x38a   : > { %1725 = vmax.xlane.f32.xlu1 %v3398_v62 }
 0x38b   : > { %v2601_v1 = vpop.f32.mrb[34].mxu1  ;;  %1727 = vmax.xlane.f32.xlu0 %v3401_v0 }
 0x38c   : > { %v1596_v3 = vpop.f32.mrb[35].mxu1  ;;  %v3414_v6 = vadd.f32 %v2601_v1, %v3375_v50 }
 0x38d   : > { %v3409_v4 = vadd.f32 %v3375_v50, %v1596_v3 }
 0x38e   : > { %1729 = vmax.xlane.f32.xlu1 %v3406_v2 }
 0x38f   : > { %v2604_v5 = vpop.f32.mrb[36].mxu1  ;;  %1731 = vmax.xlane.f32.xlu0 %v3409_v4 }
 0x390   : > { %v1606_v8 = vpop.f32.mrb[37].mxu1  ;;  %v3422_v11 = vadd.f32 %v2604_v5, %v3375_v50 }
 0x391   : > { %v3417_v9 = vadd.f32 %v3375_v50, %v1606_v8 }
 0x392   : > { %1733 = vmax.xlane.f32.xlu1 %v3414_v6 }
 0x393   : > { %v2607_v10 = vpop.f32.mrb[38].mxu1  ;;  %1735 = vmax.xlane.f32.xlu0 %v3417_v9 }
 0x394   : > { %v1616_v12 = vpop.f32.mrb[39].mxu1  ;;  %v3430_v15 = vadd.f32 %v2607_v10, %v3375_v50 }
 0x395   : > { %v3425_v13 = vadd.f32 %v3375_v50, %v1616_v12 }
 0x396   : > { %1737 = vmax.xlane.f32.xlu1 %v3422_v11 }
 0x397   : > { %v2610_v14 = vpop.f32.mrb[40].mxu1  ;;  %1739 = vmax.xlane.f32.xlu0 %v3425_v13 }
 0x398   : > { %v1626_v16 = vpop.f32.mrb[41].mxu1  ;;  %v3438_v20 = vadd.f32 %v2610_v14, %v3375_v50 }
 0x399   : > { %v3433_v18 = vadd.f32 %v3375_v50, %v1626_v16 }
 0x39a   : > { %1741 = vmax.xlane.f32.xlu1 %v3430_v15 }
 0x39b   : > { %v2613_v19 = vpop.f32.mrb[42].mxu1  ;;  %1743 = vmax.xlane.f32.xlu0 %v3433_v18 }
 0x39c   : > { %v1636_v46 = vpop.f32.mrb[43].mxu1  ;;  %v3446_v23 = vadd.f32 %v2613_v19, %v3375_v50 }
 0x39d   : > { %v3441_v21 = vadd.f32 %v3375_v50, %v1636_v46 }
 0x39e   : > { %1745 = vmax.xlane.f32.xlu1 %v3438_v20 }
 0x39f   : > { %v2616_v22 = vpop.f32.mrb[44].mxu1  ;;  %1747 = vmax.xlane.f32.xlu0 %v3441_v21 }
 0x3a0   : > { %v1646_v24 = vpop.f32.mrb[45].mxu1  ;;  %v3454_v27 = vadd.f32 %v2616_v22, %v3375_v50 }
 0x3a1   : > { %v3449_v25 = vadd.f32 %v3375_v50, %v1646_v24 }
 0x3a2   : > { %1749 = vmax.xlane.f32.xlu1 %v3446_v23 }
 0x3a3   : > { %v2619_v26 = vpop.f32.mrb[46].mxu1  ;;  %1751 = vmax.xlane.f32.xlu0 %v3449_v25 }
 0x3a4   : > { %v1656_v28 = vpop.f32.mrb[47].mxu1  ;;  %v3462_v31 = vadd.f32 %v2619_v26, %v3375_v50 }
 0x3a5   : > { %v3457_v29 = vadd.f32 %v3375_v50, %v1656_v28 }
 0x3a6   : > { %1753 = vmax.xlane.f32.xlu1 %v3454_v27 }
 0x3a7   : > { %v2622_v30 = vpop.f32.mrb[48].mxu1  ;;  %1755 = vmax.xlane.f32.xlu0 %v3457_v29 }
 0x3a8   : > { %v1666_v32 = vpop.f32.mrb[49].mxu1  ;;  %v3470_v35 = vadd.f32 %v2622_v30, %v3375_v50 }
 0x3a9   : > { %v3465_v33 = vadd.f32 %v3375_v50, %v1666_v32 }
 0x3aa   : > { %1757 = vmax.xlane.f32.xlu1 %v3462_v31 }
 0x3ab   : > { %v2625_v34 = vpop.f32.mrb[50].mxu1  ;;  %1759 = vmax.xlane.f32.xlu0 %v3465_v33 }
 0x3ac   : > { %v1676_v36 = vpop.f32.mrb[51].mxu1  ;;  %v3478_v39 = vadd.f32 %v2625_v34, %v3375_v50 }
 0x3ad   : > { %v3473_v37 = vadd.f32 %v3375_v50, %v1676_v36 }
 0x3ae   : > { %1761 = vmax.xlane.f32.xlu1 %v3470_v35 }
 0x3af   : > { %v2628_v38 = vpop.f32.mrb[52].mxu1  ;;  %1763 = vmax.xlane.f32.xlu0 %v3473_v37 }
 0x3b0   : > { %v1686_v40 = vpop.f32.mrb[53].mxu1  ;;  %v3486_v43 = vadd.f32 %v2628_v38, %v3375_v50 }
 0x3b1   : > { %v3481_v41 = vadd.f32 %v3375_v50, %v1686_v40 }
 0x3b2   : > { %1765 = vmax.xlane.f32.xlu1 %v3478_v39 }
 0x3b3   : > { %v2631_v42 = vpop.f32.mrb[54].mxu1  ;;  %1767 = vmax.xlane.f32.xlu0 %v3481_v41 }
 0x3b4   : > { %v1696_v44 = vpop.f32.mrb[55].mxu1  ;;  %v3494_v47 = vadd.f32 %v2631_v42, %v3375_v50 }
 0x3b5   : > { %v3489_v7 = vadd.f32 %v3375_v50, %v1696_v44 }
 0x3b6   : > { %1769 = vmax.xlane.f32.xlu1 %v3486_v43 }
 0x3b7   : > { %v2634_v45 = vpop.f32.mrb[56].mxu1  ;;  %1771 = vmax.xlane.f32.xlu0 %v3489_v7 }
 0x3b8   : > { %v3497_v48 = vadd.f32 %v2634_v45, %v3375_v50  ;;  %v1706_v49 = vpop.f32.mrb[57].mxu1 }
 0x3b9   : > { %v3500_v51 = vadd.f32 %v3375_v50, %v1706_v49 }
 0x3ba   : > { %1773 = vmax.xlane.f32.xlu1 %v3494_v47 }
 0x3bb   : > { %1775 = vmax.xlane.f32.xlu0 %v3500_v51 }
 0x3be   : > { %1777 = vmax.xlane.f32.xlu1 %v3497_v48 }
 0x40b   : > { %v1718_v17 = vpop.xlane.xlu0 %1717 }
 0x40c   : > { %v1780_v53 = vsub.f32 %v3378_v52, %v1718_v17 }
 0x40e   : > { %v1813_v56 = vmul.f32 1.442695, %v1780_v53 }
 0x40f   : > { %v1722_v57 = vpop.xlane.xlu1 %1721  ;;  %v1716_v59 = vpop.xlane.xlu0 %1715 }
 0x410   : > { %2743 = vpow2.f32 %v1813_v56  ;;  %v1782_v61 = vsub.f32 %v3385_v55, %v1722_v57  ;;  %v1779_v63 = vsub.f32 %v3382_v54, %v1716_v59 }
 0x412   : > { %v1817_v1 = vmul.f32 1.442695, %v1782_v61  ;;  %v1811_v50 = vmul.f32 1.442695, %v1779_v63 }
 0x413   : > { %v1720_v3 = vpop.xlane.xlu1 %1719 }
 0x414   : > { %2745 = vpow2.f32 %v1817_v1  ;;  %v1781_v5 = vsub.f32 %v3390_v58, %v1720_v3  ;;  %v1724_v8 = vpop.xlane.xlu0 %1723 }
 0x415   : > { %2747 = vpow2.f32 %v1811_v50  ;;  %v1783_v10 = vsub.f32 %v3393_v60, %v1724_v8 }
 0x416   : > { %v1815_v12 = vmul.f32 1.442695, %v1781_v5 }
 0x417   : > { %v1726_v52 = vpop.xlane.xlu1 %1725  ;;  %v1819_v19 = vmul.f32 1.442695, %v1783_v10 }
 0x418   : > { %2749 = vpow2.f32 %v1815_v12  ;;  %v1784_v14 = vsub.f32 %v3398_v62, %v1726_v52  ;;  %v1728_v16 = vpop.xlane.xlu0 %1727 }
 0x419   : > { %v1785_v55 = vsub.f32 %v3401_v0, %v1728_v16 }
 0x41a   : > { %v3512_v54 = vpop.eup %2743  ;;  %v1821_v46 = vmul.f32 1.442695, %v1784_v14 }
 0x41b   : > { %1877 = vadd.xlane.f32.xlu1 %v3512_v54  ;;  %v1730_v22 = vpop.xlane.xlu1 %1729  ;;  %v1823_v60 = vmul.f32 1.442695, %v1785_v55 }
 0x41c   : > { %2751 = vpow2.f32 %v1821_v46  ;;  %v1786_v58 = vsub.f32 %v3406_v2, %v1730_v22  ;;  %v1732_v24 = vpop.xlane.xlu0 %1731 }
 0x41d   : > { %2753 = vpow2.f32 %v1819_v19  ;;  %v1787_v26 = vsub.f32 %v3409_v4, %v1732_v24 }
 0x41e   : > { %v3517_v28 = vpop.eup %2745  ;;  %v1825_v62 = vmul.f32 1.442695, %v1786_v58 }
 0x41f   : > { %v3519_v30 = vpop.eup %2747  ;;  %1881 = vadd.xlane.f32.xlu1 %v3517_v28  ;;  %v1734_v0 = vpop.xlane.xlu1 %1733  ;;  %v1827_v2 = vmul.f32 1.442695, %v1787_v26 }
 0x420   : > { %2755 = vpow2.f32 %v1825_v62  ;;  %v1788_v32 = vsub.f32 %v3414_v6, %v1734_v0  ;;  %1875 = vadd.xlane.f32.xlu0 %v3519_v30  ;;  %v1736_v34 = vpop.xlane.xlu0 %1735 }
 0x421   : > { %2757 = vpow2.f32 %v1823_v60  ;;  %v1789_v36 = vsub.f32 %v3417_v9, %v1736_v34 }
 0x422   : > { %v3525_v38 = vpop.eup %2749  ;;  %v1829_v4 = vmul.f32 1.442695, %v1788_v32 }
 0x423   : > { %v1738_v40 = vpop.xlane.xlu1 %1737  ;;  %v1831_v45 = vmul.f32 1.442695, %v1789_v36 }
 0x424   : > { %2759 = vpow2.f32 %v1829_v4  ;;  %v1790_v42 = vsub.f32 %v3422_v11, %v1738_v40  ;;  %1879 = vadd.xlane.f32.xlu0 %v3525_v38  ;;  %v1740_v44 = vpop.xlane.xlu0 %1739 }
 0x425   : > { %2761 = vpow2.f32 %v1827_v2  ;;  %v1791_v6 = vsub.f32 %v3425_v13, %v1740_v44 }
 0x426   : > { %v3530_v49 = vpop.eup %2751  ;;  %v1833_v17 = vmul.f32 1.442695, %v1790_v42 }
 0x427   : > { %v3532_v53 = vpop.eup %2753  ;;  %1885 = vadd.xlane.f32.xlu1 %v3530_v49  ;;  %v1742_v9 = vpop.xlane.xlu1 %1741  ;;  %v1835_v57 = vmul.f32 1.442695, %v1791_v6 }
 0x428   : > { %2763 = vpow2.f32 %v1833_v17  ;;  %v1792_v56 = vsub.f32 %v3430_v15, %v1742_v9  ;;  %1883 = vadd.xlane.f32.xlu0 %v3532_v53  ;;  %v1744_v11 = vpop.xlane.xlu0 %1743 }
 0x429   : > { %2765 = vpow2.f32 %v1831_v45  ;;  %v1793_v59 = vsub.f32 %v3433_v18, %v1744_v11 }
 0x42a   : > { %v3538_v61 = vpop.eup %2755  ;;  %v1837_v13 = vmul.f32 1.442695, %v1792_v56 }
 0x42b   : > { %v3540_v63 = vpop.eup %2757  ;;  %1889 = vadd.xlane.f32.xlu1 %v3538_v61  ;;  %v1746_v1 = vpop.xlane.xlu1 %1745  ;;  %v1839_v3 = vmul.f32 1.442695, %v1793_v59 }
 0x42c   : > { %2767 = vpow2.f32 %v1837_v13  ;;  %v1794_v50 = vsub.f32 %v3438_v20, %v1746_v1  ;;  %1887 = vadd.xlane.f32.xlu0 %v3540_v63  ;;  %v1748_v15 = vpop.xlane.xlu0 %1747 }
 0x42d   : > { %2769 = vpow2.f32 %v1835_v57  ;;  %v1795_v5 = vsub.f32 %v3441_v21, %v1748_v15 }
 0x42e   : > { %v3546_v8 = vpop.eup %2759  ;;  %v1841_v18 = vmul.f32 1.442695, %v1794_v50 }
 0x42f   : > { %v3548_v10 = vpop.eup %2761  ;;  %1893 = vadd.xlane.f32.xlu1 %v3546_v8  ;;  %v1750_v12 = vpop.xlane.xlu1 %1749  ;;  %v1843_v14 = vmul.f32 1.442695, %v1795_v5 }
 0x430   : > { %2771 = vpow2.f32 %v1841_v18  ;;  %v1796_v52 = vsub.f32 %v3446_v23, %v1750_v12  ;;  %1891 = vadd.xlane.f32.xlu0 %v3548_v10  ;;  %v1752_v20 = vpop.xlane.xlu0 %1751 }
 0x431   : > { %2773 = vpow2.f32 %v1839_v3  ;;  %v1797_v16 = vsub.f32 %v3449_v25, %v1752_v20 }
 0x432   : > { %v3554_v19 = vpop.eup %2763  ;;  %v1845_v21 = vmul.f32 1.442695, %v1796_v52 }
 0x433   : > { %v3556_v55 = vpop.eup %2765  ;;  %1897 = vadd.xlane.f32.xlu1 %v3554_v19  ;;  %v1754_v46 = vpop.xlane.xlu1 %1753  ;;  %v1847_v58 = vmul.f32 1.442695, %v1797_v16 }
 0x434   : > { %2775 = vpow2.f32 %v1845_v21  ;;  %v1798_v22 = vsub.f32 %v3454_v27, %v1754_v46  ;;  %1895 = vadd.xlane.f32.xlu0 %v3556_v55  ;;  %v1756_v23 = vpop.xlane.xlu0 %1755 }
 0x435   : > { %2777 = vpow2.f32 %v1843_v14  ;;  %v1799_v24 = vsub.f32 %v3457_v29, %v1756_v23 }
 0x436   : > { %v3562_v60 = vpop.eup %2767  ;;  %v1849_v25 = vmul.f32 1.442695, %v1798_v22 }
 0x437   : > { %v3564_v26 = vpop.eup %2769  ;;  %1901 = vadd.xlane.f32.xlu1 %v3562_v60  ;;  %v1758_v62 = vpop.xlane.xlu1 %1757  ;;  %v1851_v32 = vmul.f32 1.442695, %v1799_v24 }
 0x438   : > { %2779 = vpow2.f32 %v1849_v25  ;;  %v1800_v0 = vsub.f32 %v3462_v31, %v1758_v62  ;;  %1899 = vadd.xlane.f32.xlu0 %v3564_v26  ;;  %v1760_v27 = vpop.xlane.xlu0 %1759 }
 0x439   : > { %2781 = vpow2.f32 %v1847_v58  ;;  %v1801_v34 = vsub.f32 %v3465_v33, %v1760_v27 }
 0x43a   : > { %v3570_v2 = vpop.eup %2771  ;;  %v1853_v29 = vmul.f32 1.442695, %v1800_v0 }
 0x43b   : > { %v3572_v36 = vpop.eup %2773  ;;  %1905 = vadd.xlane.f32.xlu1 %v3570_v2  ;;  %v1762_v4 = vpop.xlane.xlu1 %1761  ;;  %v1855_v42 = vmul.f32 1.442695, %v1801_v34 }
 0x43c   : > { %2783 = vpow2.f32 %v1853_v29  ;;  %v1802_v40 = vsub.f32 %v3470_v35, %v1762_v4  ;;  %1903 = vadd.xlane.f32.xlu0 %v3572_v36  ;;  %v1764_v31 = vpop.xlane.xlu0 %1763 }
 0x43d   : > { %2785 = vpow2.f32 %v1851_v32  ;;  %v1803_v44 = vsub.f32 %v3473_v37, %v1764_v31 }
 0x43e   : > { %v3578_v45 = vpop.eup %2775  ;;  %v1857_v33 = vmul.f32 1.442695, %v1802_v40 }
 0x43f   : > { %v3580_v6 = vpop.eup %2777  ;;  %1909 = vadd.xlane.f32.xlu1 %v3578_v45  ;;  %v1766_v17 = vpop.xlane.xlu1 %1765  ;;  %v1859_v56 = vmul.f32 1.442695, %v1803_v44 }
 0x440   : > { %2787 = vpow2.f32 %v1857_v33  ;;  %v1804_v9 = vsub.f32 %v3478_v39, %v1766_v17  ;;  %1907 = vadd.xlane.f32.xlu0 %v3580_v6  ;;  %v1768_v35 = vpop.xlane.xlu0 %1767 }
 0x441   : > { %2789 = vpow2.f32 %v1855_v42  ;;  %v1805_v11 = vsub.f32 %v3481_v41, %v1768_v35 }
 0x442   : > { %v3586_v57 = vpop.eup %2779  ;;  %v1861_v37 = vmul.f32 1.442695, %v1804_v9 }
 0x443   : > { %v3588_v59 = vpop.eup %2781  ;;  %1913 = vadd.xlane.f32.xlu1 %v3586_v57  ;;  %v1770_v13 = vpop.xlane.xlu1 %1769  ;;  %v1863_v50 = vmul.f32 1.442695, %v1805_v11 }
 0x444   : > { %2791 = vpow2.f32 %v1861_v37  ;;  %v1806_v1 = vsub.f32 %v3486_v43, %v1770_v13  ;;  %1911 = vadd.xlane.f32.xlu0 %v3588_v59  ;;  %v1772_v39 = vpop.xlane.xlu0 %1771 }
 0x445   : > { %2793 = vpow2.f32 %v1859_v56  ;;  %v1807_v15 = vsub.f32 %v3489_v7, %v1772_v39 }
 0x446   : > { %v3594_v3 = vpop.eup %2783  ;;  %v1865_v41 = vmul.f32 1.442695, %v1806_v1 }
 0x447   : > { %v3596_v5 = vpop.eup %2785  ;;  %1917 = vadd.xlane.f32.xlu1 %v3594_v3  ;;  %v1774_v18 = vpop.xlane.xlu1 %1773  ;;  %v1867_v52 = vmul.f32 1.442695, %v1807_v15 }
 0x448   : > { %2795 = vpow2.f32 %v1865_v41  ;;  %v1808_v12 = vsub.f32 %v3494_v47, %v1774_v18  ;;  %1915 = vadd.xlane.f32.xlu0 %v3596_v5  ;;  %v1776_v43 = vpop.xlane.xlu0 %1775 }
 0x449   : > { %2797 = vpow2.f32 %v1863_v50  ;;  %v1809_v20 = vsub.f32 %v3500_v51, %v1776_v43 }
 0x44a   : > { %v3602_v14 = vpop.eup %2787  ;;  %v1869_v7 = vmul.f32 1.442695, %v1808_v12 }
 0x44b   : > { %v3604_v16 = vpop.eup %2789  ;;  %1921 = vadd.xlane.f32.xlu1 %v3602_v14  ;;  %v1778_v21 = vpop.xlane.xlu1 %1777  ;;  %v1871_v47 = vmul.f32 1.442695, %v1809_v20 }
 0x44c   : > { %2799 = vpow2.f32 %v1869_v7  ;;  %v1810_v46 = vsub.f32 %v3497_v48, %v1778_v21  ;;  %1919 = vadd.xlane.f32.xlu0 %v3604_v16 }
 0x44d   : > { %2801 = vpow2.f32 %v1867_v52 }
 0x44e   : > { %v3609_v22 = vpop.eup %2791  ;;  %v1873_v23 = vmul.f32 1.442695, %v1810_v46 }
 0x44f   : > { %v3611_v58 = vpop.eup %2793  ;;  %1925 = vadd.xlane.f32.xlu1 %v3609_v22 }
 0x450   : > { %2803 = vpow2.f32 %v1873_v23  ;;  %1923 = vadd.xlane.f32.xlu0 %v3611_v58 }
 0x451   : > { %2805 = vpow2.f32 %v1871_v47 }
 0x452   : > { %v3615_v51 = vpop.eup %2795 }
 0x453   : > { %v3617_v24 = vpop.eup %2797  ;;  %1929 = vadd.xlane.f32.xlu1 %v3615_v51 }
 0x454   : > { %1927 = vadd.xlane.f32.xlu0 %v3617_v24 }
 0x456   : > { %v3621_v48 = vpop.eup %2799 }
 0x457   : > { %v3623_v25 = vpop.eup %2801  ;;  %1933 = vadd.xlane.f32.xlu1 %v3621_v48 }
 0x458   : > { %1931 = vadd.xlane.f32.xlu0 %v3623_v25 }
 0x45a   : > { %v3627_v62 = vpop.eup %2803 }
 0x45b   : > { %v3629_v0 = vpop.eup %2805  ;;  %1937 = vadd.xlane.f32.xlu1 %v3627_v62 }
 0x45c   : > { %1935 = vadd.xlane.f32.xlu0 %v3629_v0 }
 0x4a8   : > { %v1878_v27 = vpop.xlane.xlu1 %1877 }
 0x4a9   : > { %2807 = vrcp.f32 %v1878_v27 }
 0x4ac   : > { %v1882_v32 = vpop.xlane.xlu1 %1881 }
 0x4ad   : > { %2809 = vrcp.f32 %v1882_v32  ;;  %v1876_v34 = vpop.xlane.xlu0 %1875 }
 0x4ae   : > { %2811 = vrcp.f32 %v1876_v34 }
 0x4b1   : > { %v1880_v29 = vpop.xlane.xlu0 %1879 }
 0x4b2   : > { %2813 = vrcp.f32 %v1880_v29 }
 0x4b3   : > { %v2808_v4 = vpop.eup %2807 }
 0x4b4   : > { %v1972_v40 = vmul.f32 %v2808_v4, %v3512_v54  ;;  %v1886_v31 = vpop.xlane.xlu1 %1885 }
 0x4b5   : > { %2815 = vrcp.f32 %v1886_v31  ;;  %v1884_v42 = vpop.xlane.xlu0 %1883 }
 0x4b6   : > { %2004 = vst [vmem:[%s3637_s26 + $0x8] sm:$0xff] %v1972_v40  ;;  %2817 = vrcp.f32 %v1884_v42 }
 0x4b7   : > { %v2810_v44 = vpop.eup %2809 }
 0x4b8   : > { %v2812_v33 = vpop.eup %2811  ;;  %v1974_v17 = vmul.f32 %v2810_v44, %v3517_v28  ;;  %v1890_v9 = vpop.xlane.xlu1 %1889 }
 0x4b9   : > { %v1971_v35 = vmul.f32 %v2812_v33, %v3519_v30  ;;  %2819 = vrcp.f32 %v1890_v9  ;;  %v1888_v54 = vpop.xlane.xlu0 %1887 }
 0x4ba   : > { %2006 = vst [vmem:[%s3637_s26 + $0x18] sm:$0xff] %v1974_v17  ;;  %2821 = vrcp.f32 %v1888_v54 }
 0x4bb   : > { %2003 = vst [vmem:[%s3637_s26] sm:$0xff] %v1971_v35 }
 0x4bc   : > { %v2814_v56 = vpop.eup %2813  ;;  %v1894_v11 = vpop.xlane.xlu1 %1893 }
 0x4bd   : > { %v1973_v37 = vmul.f32 %v2814_v56, %v3525_v38  ;;  %2823 = vrcp.f32 %v1894_v11  ;;  %v1892_v13 = vpop.xlane.xlu0 %1891 }
 0x4be   : > { %2825 = vrcp.f32 %v1892_v13 }
 0x4bf   : > { %v2816_v1 = vpop.eup %2815  ;;  %2005 = vst [vmem:[%s3637_s26 + $0x10] sm:$0xff] %v1973_v37 }
 0x4c0   : > { %v2818_v28 = vpop.eup %2817  ;;  %v1976_v30 = vmul.f32 %v2816_v1, %v3530_v49  ;;  %v1898_v39 = vpop.xlane.xlu1 %1897 }
 0x4c1   : > { %v1975_v50 = vmul.f32 %v2818_v28, %v3532_v53  ;;  %2827 = vrcp.f32 %v1898_v39  ;;  %v1896_v15 = vpop.xlane.xlu0 %1895 }
 0x4c2   : > { %2008 = vst [vmem:[%s3637_s26 + $0x28] sm:$0xff] %v1976_v30  ;;  %2829 = vrcp.f32 %v1896_v15 }
 0x4c3   : > { %v2820_v41 = vpop.eup %2819  ;;  %2007 = vst [vmem:[%s3637_s26 + $0x20] sm:$0xff] %v1975_v50 }
 0x4c4   : > { %v2822_v38 = vpop.eup %2821  ;;  %v1978_v18 = vmul.f32 %v2820_v41, %v3538_v61  ;;  %v1902_v12 = vpop.xlane.xlu1 %1901 }
 0x4c5   : > { %v1977_v43 = vmul.f32 %v2822_v38, %v3540_v63  ;;  %2831 = vrcp.f32 %v1902_v12  ;;  %v1900_v49 = vpop.xlane.xlu0 %1899 }
 0x4c6   : > { %2010 = vst [vmem:[%s3637_s26 + $0x38] sm:$0xff] %v1978_v18  ;;  %2833 = vrcp.f32 %v1900_v49 }
 0x4c7   : > { %v2824_v53 = vpop.eup %2823  ;;  %2009 = vst [vmem:[%s3637_s26 + $0x30] sm:$0xff] %v1977_v43 }
 0x4c8   : > { %v2826_v52 = vpop.eup %2825  ;;  %v1980_v20 = vmul.f32 %v2824_v53, %v3546_v8  ;;  %v1906_v7 = vpop.xlane.xlu1 %1905 }
 0x4c9   : > { %v1979_v21 = vmul.f32 %v2826_v52, %v3548_v10  ;;  %2835 = vrcp.f32 %v1906_v7  ;;  %v1904_v61 = vpop.xlane.xlu0 %1903 }
 0x4ca   : > { %2012 = vst [vmem:[%s3637_s26 + $0x48] sm:$0xff] %v1980_v20  ;;  %2837 = vrcp.f32 %v1904_v61 }
 0x4cb   : > { %v2828_v63 = vpop.eup %2827  ;;  %2011 = vst [vmem:[%s3637_s26 + $0x40] sm:$0xff] %v1979_v21 }
 0x4cc   : > { %v2830_v46 = vpop.eup %2829  ;;  %v1982_v47 = vmul.f32 %v2828_v63, %v3554_v19  ;;  %v1910_v23 = vpop.xlane.xlu1 %1909 }
 0x4cd   : > { %v1981_v27 = vmul.f32 %v2830_v46, %v3556_v55  ;;  %2839 = vrcp.f32 %v1910_v23  ;;  %v1908_v8 = vpop.xlane.xlu0 %1907 }
 0x4ce   : > { %2014 = vst [vmem:[%s3637_s26 + $0x58] sm:$0xff] %v1982_v47  ;;  %2841 = vrcp.f32 %v1908_v8 }
 0x4cf   : > { %v2832_v10 = vpop.eup %2831  ;;  %2013 = vst [vmem:[%s3637_s26 + $0x50] sm:$0xff] %v1981_v27 }
 0x4d0   : > { %v2834_v32 = vpop.eup %2833  ;;  %v1984_v34 = vmul.f32 %v2832_v10, %v3562_v60  ;;  %v1914_v29 = vpop.xlane.xlu1 %1913 }
 0x4d1   : > { %v1983_v4 = vmul.f32 %v2834_v32, %v3564_v26  ;;  %2843 = vrcp.f32 %v1914_v29  ;;  %v1912_v19 = vpop.xlane.xlu0 %1911 }
 0x4d2   : > { %2016 = vst [vmem:[%s3637_s26 + $0x68] sm:$0xff] %v1984_v34  ;;  %2845 = vrcp.f32 %v1912_v19 }
 0x4d3   : > { %v2836_v55 = vpop.eup %2835  ;;  %2015 = vst [vmem:[%s3637_s26 + $0x60] sm:$0xff] %v1983_v4 }
 0x4d4   : > { %v2838_v40 = vpop.eup %2837  ;;  %v1986_v31 = vmul.f32 %v2836_v55, %v3570_v2  ;;  %v1918_v42 = vpop.xlane.xlu1 %1917 }
 0x4d5   : > { %v1985_v44 = vmul.f32 %v2838_v40, %v3572_v36  ;;  %2847 = vrcp.f32 %v1918_v42  ;;  %v1916_v60 = vpop.xlane.xlu0 %1915 }
 0x4d6   : > { %2018 = vst [vmem:[%s3637_s26 + $0x78] sm:$0xff] %v1986_v31  ;;  %2849 = vrcp.f32 %v1916_v60 }
 0x4d7   : > { %v2840_v26 = vpop.eup %2839  ;;  %2017 = vst [vmem:[%s3637_s26 + $0x70] sm:$0xff] %v1985_v44 }
 0x4d8   : > { %v2842_v33 = vpop.eup %2841  ;;  %v1988_v17 = vmul.f32 %v2840_v26, %v3578_v45  ;;  %v1922_v9 = vpop.xlane.xlu1 %1921 }
 0x4d9   : > { %v1987_v35 = vmul.f32 %v2842_v33, %v3580_v6  ;;  %2851 = vrcp.f32 %v1922_v9  ;;  %v1920_v2 = vpop.xlane.xlu0 %1919 }
 0x4da   : > { %2020 = vst [vmem:[%s3637_s26 + $0x88] sm:$0xff] %v1988_v17  ;;  %2853 = vrcp.f32 %v1920_v2 }
 0x4db   : > { %v2844_v36 = vpop.eup %2843  ;;  %2019 = vst [vmem:[%s3637_s26 + $0x80] sm:$0xff] %v1987_v35 }
 0x4dc   : > { %v2846_v54 = vpop.eup %2845  ;;  %v1990_v56 = vmul.f32 %v2844_v36, %v3586_v57  ;;  %v1926_v11 = vpop.xlane.xlu1 %1925 }
 0x4dd   : > { %v1989_v37 = vmul.f32 %v2846_v54, %v3588_v59  ;;  %2855 = vrcp.f32 %v1926_v11  ;;  %v1924_v45 = vpop.xlane.xlu0 %1923 }
 0x4de   : > { %2022 = vst [vmem:[%s3637_s26 + $0x98] sm:$0xff] %v1990_v56  ;;  %2857 = vrcp.f32 %v1924_v45 }
 0x4df   : > { %v2848_v6 = vpop.eup %2847  ;;  %2021 = vst [vmem:[%s3637_s26 + $0x90] sm:$0xff] %v1989_v37 }
 0x4e0   : > { %v2850_v13 = vpop.eup %2849  ;;  %v1992_v1 = vmul.f32 %v2848_v6, %v3594_v3  ;;  %v1930_v28 = vpop.xlane.xlu1 %1929 }
 0x4e1   : > { %v1991_v30 = vmul.f32 %v2850_v13, %v3596_v5  ;;  %2859 = vrcp.f32 %v1930_v28  ;;  %v1928_v57 = vpop.xlane.xlu0 %1927 }
 0x4e2   : > { %2024 = vst [vmem:[%s3637_s26 + $0xa8] sm:$0xff] %v1992_v1  ;;  %2861 = vrcp.f32 %v1928_v57 }
 0x4e3   : > { %v2852_v59 = vpop.eup %2851  ;;  %2023 = vst [vmem:[%s3637_s26 + $0xa0] sm:$0xff] %v1991_v30 }
 0x4e4   : > { %v2854_v39 = vpop.eup %2853  ;;  %v1994_v50 = vmul.f32 %v2852_v59, %v3602_v14  ;;  %v1934_v15 = vpop.xlane.xlu1 %1933 }
 0x4e5   : > { %v1993_v41 = vmul.f32 %v2854_v39, %v3604_v16  ;;  %2863 = vrcp.f32 %v1934_v15  ;;  %v1932_v3 = vpop.xlane.xlu0 %1931 }
 0x4e6   : > { %2026 = vst [vmem:[%s3637_s26 + $0xb8] sm:$0xff] %v1994_v50  ;;  %2865 = vrcp.f32 %v1932_v3 }
 0x4e7   : > { %v2856_v5 = vpop.eup %2855  ;;  %2025 = vst [vmem:[%s3637_s26 + $0xb0] sm:$0xff] %v1993_v41 }
 0x4e8   : > { %v2858_v38 = vpop.eup %2857  ;;  %v1996_v18 = vmul.f32 %v2856_v5, %v3609_v22  ;;  %v1938_v12 = vpop.xlane.xlu1 %1937 }
 0x4e9   : > { %v1995_v43 = vmul.f32 %v2858_v38, %v3611_v58  ;;  %2867 = vrcp.f32 %v1938_v12  ;;  %v1936_v14 = vpop.xlane.xlu0 %1935 }
 0x4ea   : > { %2028 = vst [vmem:[%s3637_s26 + $0xc8] sm:$0xff] %v1996_v18  ;;  %2869 = vrcp.f32 %v1936_v14 }
 0x4eb   : > { %v2860_v16 = vpop.eup %2859  ;;  %2027 = vst [vmem:[%s3637_s26 + $0xc0] sm:$0xff] %v1995_v43 }
 0x4ec   : > { %v2862_v49 = vpop.eup %2861  ;;  %v1998_v53 = vmul.f32 %v2860_v16, %v3615_v51 }
 0x4ed   : > { %v1997_v52 = vmul.f32 %v2862_v49, %v3617_v24 }
 0x4ee   : > { %2030 = vst [vmem:[%s3637_s26 + $0xd8] sm:$0xff] %v1998_v53 }
 0x4ef   : > { %v2864_v22 = vpop.eup %2863  ;;  %2029 = vst [vmem:[%s3637_s26 + $0xd0] sm:$0xff] %v1997_v52 }
 0x4f0   : > { %v2866_v58 = vpop.eup %2865  ;;  %v2000_v20 = vmul.f32 %v2864_v22, %v3621_v48 }
 0x4f1   : > { %v1999_v7 = vmul.f32 %v2866_v58, %v3623_v25 }
 0x4f2   : > { %2032 = vst [vmem:[%s3637_s26 + $0xe8] sm:$0xff] %v2000_v20 }
 0x4f3   : > { %v2868_v21 = vpop.eup %2867  ;;  %2031 = vst [vmem:[%s3637_s26 + $0xe0] sm:$0xff] %v1999_v7 }
 0x4f4   : > { %v2870_v51 = vpop.eup %2869  ;;  %v2002_v24 = vmul.f32 %v2868_v21, %v3627_v62 }
 0x4f5   : > { %v2001_v48 = vmul.f32 %v2870_v51, %v3629_v0 }
 0x4f6   : > { %2034 = vst [vmem:[%s3637_s26 + $0xf8] sm:$0xff] %v2002_v24 }
 0x4f7   : > { %2033 = vst [vmem:[%s3637_s26 + $0xf0] sm:$0xff] %v2001_v48 }
 0x4f8   : > { %2884 = shalt.err (!%p2881_p3)
}
 0x4f9   : > { %s2885_s23 = scalar_lea.hbm %s3704_s17, 4096  ;;  %s2889_s27 = scalar_lea.hbm %s3763_s9, 8192 }
 0x4fa   : > { %p2886_p4 = scmp.ne.s32.totalorder %s3704_s17, %s2885_s23  ;;  %p2890_p9 = scmp.lt.u32.totalorder %s3704_s17, %s3763_s9 }
 0x4fb   : > { %p2891_p10 = scmp.lt.u32.totalorder %s2889_s27, %s2885_s23  ;;  %p2893_p12 = scmp.lt.u32.totalorder %s2885_s23, %s3704_s17 }
 0x4fc   : > { %p2887_p7 = pnand %p2886_p4, %p3027_p5 }
 0x4fd   : > { %p2892_p11 = por %p2891_p10, %p2890_p9 }
 0x4fe   : > { %p2888_p8 = pneg %p2887_p7 }
 0x4ff   : > { %p2894_p13 = por %p2893_p12, %p2892_p11 }
 0x501   : > { %p2895_p0 = pnand %p2894_p13, %p2888_p8 }
 0x503   : > { %2898 = shalt.err (!%p2895_p0)
}
 0x504   : > { %s2937_s14 = smov 128   ;;  %s2938_s21 = smov 8  }
 0x505   : > { %2701 = dma.vmem_to_hbm [thread:$0]  (%p3027_p5), %s3706_s28, 4096, %s3704_s17, %s3713_s13, %s2937_s14, %s2937_s14, %s2938_s21  }
 0x506 PF: > { %p2707_p1 = scmp.ge.s32.totalorder %s2933_s12, 2  ;;  %s2064_s25 = sand.u32 1, %s2921_s30  }
 0x507   : > { %s2065_s22 = scalar_lea.sflag [#allocation3], %s2064_s25 }
 0x508   : > { %p2704_p2 = pnand %p2707_p1, %p3031_p6 }
 0x50a   : > { %2916 = dma.done.wait (!%p2704_p2), %s2065_s22, 4096  }
 0x50b   : > { %2918 = vsyncadd (!%p2704_p2), %s2065_s22, 4294963200  ;;  %p19_p3 = scmp.ge.s32.totalorder %s3014_s15, 4   ;;  %s3766_s30 = smov %s2925_s10 }
 0x50c   : > { %s3767_s10 = smov %s2929_s11  ;;  %s3768_s11 = smov %s3025_s18 }
 0x50d   : > { %s3769_s12 = smov %s3014_s15  ;;  %21 = sbr.rel (!%p19_p3) target bundleno = 3 (0x3), region = 91 }
 0x514   :  { %2070 = vsyncpa [#allocation3], 1 }
 0x515   :  { %2072 = vsyncpa [#allocation3 + $0x1], 1 }

</bundles_post_ra>
